<compile_context>
chip_gen: v5e
topology: v5e:2x2
jax: 0.10.0
libtpu: 0.0.40
codegen_flags: <defaults>
</compile_context>

<pallas_src>
import jax
import jax.numpy as jnp
from jax import lax
from jax.experimental import pallas as pl
from jax.experimental.pallas import tpu as pltpu


# ------------------------------ kernel ------------------------------------ #

def _fused_matmul_kernel(x_ref, w_ref, o_ref):
    # x_ref: (Bt, K)  lane-dense batch tile of flattened inputs (K = co*sm*sn)
    # w_ref: (K, N)   fused weight, resident across all grid steps (N = ci*m*n)
    # o_ref: (Bt, N)  lane-dense output tile
    o_ref[...] = jnp.dot(
        x_ref[...], w_ref[...], preferred_element_type=jnp.float32
    ).astype(o_ref.dtype)


# ------------------------------ wrapper ----------------------------------- #

def build_fused_weight(L, R, C, dtype=jnp.float32):
    """Wt[(co,si,ti),(ci,mi,ni)] = C[ci,co] * L[si,mi] * R[ni,ti]  (K, N)."""
    ci, co = C.shape
    sm, m = L.shape
    n, sn = R.shape
    Wt = jnp.einsum("ic,sa,bt->cstiab", C, L, R)     # pure outer product: exact
    return Wt.reshape(co * sm * sn, ci * m * n).astype(dtype)


def _pick_batch_tile(B, block_b):
    """Sublane-aligned batch tile with >=2 grid steps whenever B allows."""
    half = -(-B // 2)                 # cdiv(B, 2): guarantees >=2 steps (v7x: 2 TCs)
    half = -(-half // 8) * 8          # round up to a sublane multiple
    bt = min(max(8, (block_b // 8) * 8), max(half, 8))
    return bt


def _sample_transpose_fused(x_flat, Wt, out_dtype, ci, m, n, *, block_b):
    B, K = x_flat.shape
    N = Wt.shape[1]
    Bt = _pick_batch_tile(B, block_b)
    grid = (pl.cdiv(B, Bt),)          # ragged last block is fine: no cross-row reduction,
                                      # out-of-range output rows are masked by Pallas.

    in_item = jnp.dtype(x_flat.dtype).itemsize
    w_item = jnp.dtype(Wt.dtype).itemsize
    out_item = jnp.dtype(out_dtype).itemsize

    # Double-buffered x/out tiles + (double-buffered) resident weight + slack.
    vmem_est = 2 * (Bt * K * in_item + Bt * N * out_item + K * N * w_item) + (2 << 20)
    vmem_limit = int(max(vmem_est, 32 << 20))   # never below the default scoped limit

    cost = pl.CostEstimate(
        flops=2 * B * K * N,
        transcendentals=0,
        bytes_accessed=B * K * in_item + K * N * w_item + B * N * out_item,
    )

    out_flat = pl.pallas_call(
        _fused_matmul_kernel,
        out_shape=jax.ShapeDtypeStruct((B, N), out_dtype),
        grid=grid,
        in_specs=[
            pl.BlockSpec((Bt, K), lambda i: (i, 0)),
            pl.BlockSpec((K, N), lambda i: (0, 0)),   # constant index_map: weight stays put
        ],
        out_specs=pl.BlockSpec((Bt, N), lambda i: (i, 0)),
        compiler_params=pltpu.CompilerParams(
            dimension_semantics=("parallel",),         # shard batch tiles across TCs
            vmem_limit_bytes=vmem_limit,
        ),
        cost_estimate=cost,
    )(x_flat, Wt)

    return out_flat.reshape(B, ci, m, n)


def make_sample_transpose(L, R, C, *, block_b=1024, compute_dtype=None):
    """Build a jitted forward f(x) for Sample.tranpose_forward.

    L: (sm, m), R: (n, sn), C: (channel_in, channel_out); x: (B, channel_out, sm, sn).
    The Kronecker-fused weight is precomputed once here (hoisted out of the
    per-call path).  compute_dtype=jnp.bfloat16 gives bf16 MXU inputs with f32
    accumulation (recommended on v5e/v6e); output keeps x.dtype.
    """
    ci, co = C.shape
    sm, m = L.shape
    n, sn = R.shape
    Wt_f32 = build_fused_weight(L, R, C, dtype=jnp.float32)   # built once, reused

    @jax.jit
    def fwd(x):
        assert x.shape[1:] == (co, sm, sn)
        out_dtype = x.dtype
        dt = compute_dtype if compute_dtype is not None else x.dtype
        x_flat = x.reshape(x.shape[0], co * sm * sn).astype(dt)
        Wt = Wt_f32.astype(dt)            # constant-folded under jit
        return _sample_transpose_fused(x_flat, Wt, out_dtype, ci, m, n, block_b=block_b)

    return fwd


def sample_transpose(x, L, R, C, *, block_b=1024, compute_dtype=None):
    """One-shot convenience wrapper (prefer make_sample_transpose for reuse)."""
    return make_sample_transpose(L, R, C, block_b=block_b,
                                 compute_dtype=compute_dtype)(x)


# ------------------------------ reference --------------------------------- #

def sample_transpose_ref(x, L, R, C):
    """Pure-JAX mirror of the PyTorch Sample.tranpose_forward."""
    hp = lax.Precision.HIGHEST
    y = jnp.transpose(x, (0, 2, 3, 1))                       # (B, sm, sn, co)
    y = jnp.matmul(y, C.T.astype(x.dtype), precision=hp)     # (B, sm, sn, ci)
    y = jnp.transpose(y, (0, 3, 1, 2))                       # (B, ci, sm, sn)
    y = jnp.matmul(y, R.T.astype(x.dtype), precision=hp)     # (B, ci, sm, n)
    y = jnp.matmul(L.T.astype(x.dtype), y, precision=hp)     # (B, ci, m, n)
    return y


# ------------------------------ demo -------------------------------------- #

if __name__ == "__main__":
    # Module config: Sample(channel_out, channel_in, sample_size, high_res_size)
    channel_out, channel_in = 6, 4
    sm, sn = 8, 8          # sample_size
    m, n = 16, 16          # high_res_size
    B = 64                 # small batch; tile picker gives Bt=32 -> 2 grid steps

    key = jax.random.PRNGKey(0)
    kL, kR, kC, kx = jax.random.split(key, 4)
    L = jax.random.normal(kL, (sm, m), dtype=jnp.float32) * 0.1
    R = jax.random.normal(kR, (n, sn), dtype=jnp.float32) * 0.1
    C = jax.random.normal(kC, (channel_in, channel_out), dtype=jnp.float32) * 0.1

    # tranpose_forward expects x of shape (B, channel_out, sm, sn)
    x = jax.random.normal(kx, (B, channel_out, sm, sn), dtype=jnp.float32)

    ref = sample_transpose_ref(x, L, R, C)

    # f32 path (tight check against the staged reference).
    fwd = make_sample_transpose(L, R, C)
    out = jax.block_until_ready(fwd(x))
    assert out.shape == (B, channel_in, m, n)
    assert jnp.allclose(out, ref, atol=1e-4, rtol=1e-4), \
        float(jnp.max(jnp.abs(out - ref)))

    # bf16-input / f32-accumulate path (looser tolerance; recommended on v5e/v6e).
    fwd_bf16 = make_sample_transpose(L, R, C, compute_dtype=jnp.bfloat16)
    out_bf16 = jax.block_until_ready(fwd_bf16(x))
    assert out_bf16.shape == (B, channel_in, m, n)
    assert jnp.allclose(out_bf16, ref, atol=5e-3, rtol=5e-2), \
        float(jnp.max(jnp.abs(out_bf16 - ref)))

    print("KERNEL_OK")
</pallas_src>

<mosaic_0001>
module attributes {stable_mosaic.version = 11 : i64} {
  func.func @_fused_matmul_kernel(%arg0: i32, %arg1: memref<32x384xf32, #tpu.memory_space<vmem>>, %arg2: memref<384x1024xf32, #tpu.memory_space<vmem>>, %arg3: memref<32x1024xf32, #tpu.memory_space<vmem>>) attributes {dimension_semantics = [#tpu.dimension_semantics<parallel>], iteration_bounds = array<i64: 2>, scalar_prefetch = 0 : i64, scratch_operands = 0 : i64, tpu.core_type = #tpu.core_type<tc>, window_params = [{transform_indices = @transform_0, window_bounds = array<i64: 32, 384>}, {pipeline_mode = #tpu.pipeline_mode<synchronous>, transform_indices = @transform_1, window_bounds = array<i64: 384, 1024>}, {transform_indices = @transform_2, window_bounds = array<i64: 32, 1024>}]} {
    %c0 = arith.constant 0 : index
    %c0_0 = arith.constant 0 : index
    %0 = vector.load %arg1[%c0, %c0_0] : memref<32x384xf32, #tpu.memory_space<vmem>>, vector<32x384xf32>
    %c0_1 = arith.constant 0 : index
    %c0_2 = arith.constant 0 : index
    %1 = vector.load %arg2[%c0_1, %c0_2] : memref<384x1024xf32, #tpu.memory_space<vmem>>, vector<384x1024xf32>
    %cst = arith.constant dense<0.000000e+00> : vector<32x1024xf32>
    %2 = tpu.matmul %0, %1, %cst {dimension_numbers = #tpu.dot_dimension_numbers<[1], [0], [0], [1], [0, 0, 1, 1], [], []>} : vector<32x384xf32>, vector<384x1024xf32>, vector<32x1024xf32> -> vector<32x1024xf32>
    %c0_3 = arith.constant 0 : index
    %c0_4 = arith.constant 0 : index
    %3 = vector.load %arg3[%c0_3, %c0_4] : memref<32x1024xf32, #tpu.memory_space<vmem>>, vector<32x1024xf32>
    tpu.vector_store %arg3[%c0_3, %c0_4], %2 {strides = array<i32>} : memref<32x1024xf32, #tpu.memory_space<vmem>>, vector<32x1024xf32>,
    return
  }
  func.func @transform_0(%arg0: i32) -> (i32, i32) {
    %c0_i32 = arith.constant 0 : i32
    %c0_i32_0 = arith.constant 0 : i32
    return %arg0, %c0_i32 : i32, i32
  }
  func.func @transform_1(%arg0: i32) -> (i32, i32) {
    %c0_i32 = arith.constant 0 : i32
    %c0_i32_0 = arith.constant 0 : i32
    %c0_i32_1 = arith.constant 0 : i32
    return %c0_i32, %c0_i32_0 : i32, i32
  }
  func.func @transform_2(%arg0: i32) -> (i32, i32) {
    %c0_i32 = arith.constant 0 : i32
    %c0_i32_0 = arith.constant 0 : i32
    return %arg0, %c0_i32 : i32, i32
  }
}

</mosaic_0001>

<bundles_post_ra>
// kernel: fwd.1
= control target key start
LH: loop header
LB: loop body
LE: loop exit
PB: predicated region body
PF: predicated region fallthrough
CT: control target
= control target key end

     0   :  { %7 = vsyncpa [#allocation3], 0  ;;  %s1472_s9 = smov 0   ;;  %s1737_s0 = inlined_call_operand.vmem [shape: f32[64,384], index: 0, kind: input, shape index: {}]   ;;  %s1738_s1 = inlined_call_operand.hbm [shape: f32[384,1024], index: 1, kind: input, shape index: {}]   ;;  %s1739_s2 = inlined_call_operand.vmem [shape: f32[64,1024], index: 2, kind: output, shape index: {}]  }
   0x1 LB: > { %s102_s12 = sshll.u32 %s1738_s1, 4  ;;  %s1363_s13 = sadd.s32 4294967295, %s1452_s9   ;;  %s1452_s9 = sphi %s1472_s9, %s13_s9   ;;  %s103_s12 = int_to_ptr.hbm [resolvable:$true] %s102_s12 }
   0x2   : > { %p1365_p0 = scmp.ge.s32.totalorder %s1452_s9, 1  ;;  %p91_p1 = scmp.lt.s32.totalorder %s1452_s9, 3 }
   0x3   : > { %p1387_p2 = scmp.eq.s32.totalorder %s1363_s13, 0  ;;  %s1454_s14 = smov [#allocation2]  }
   0x4   : > { %p92_p3 = pnand %p1365_p0, %p91_p1  ;;  %s104_s15 = sshll.u32 %s1454_s14, 4  ;;  %s105_s15 = int_to_ptr.vmem [resolvable:$true] %s104_s15 }
   0x5   : > { %s1455_s16 = smov 1024   ;;  %s1456_s17 = smov 64  }
   0x6   : > { %p1383_p4 = pneg %p92_p3  ;;  %130 = sbr.rel (%p92_p3) target bundleno = 416 (0x1a0), region = 28 }
   0x8   : > { %p1384_p5 = pnand %p1387_p2, %p1383_p4 }
   0xa   : > { %1386 = dma.hbm_to_vmem [thread:$0]  (!%p1384_p5), %s103_s12, 49152, %s105_s15, [#allocation3], %s1455_s16, %s1455_s16, %s1456_s17  }
   0xb   : > { %1447 = dma.done.wait (%p1387_p2), [#allocation3], 49152  }
   0xc   : > { %1449 = vsyncadd (%p1387_p2), [#allocation3], 4294918144  ;;  %v301_v0 = vld [vmem:[#allocation2 + $0x3c0] sm:$0xff]  ;;  %v302_v2 = vld [vmem:[#allocation2 + $0x3c8] sm:$0xff]  ;;  %s1487_s18 = sshll.u32 %s1363_s13, 2 }
   0xd   : > { %v557_v1 = vld [vmem:[#allocation2 + $0xbc0] sm:$0xff]  ;;  %565 = vmatpush.msra.mxu0 %v301_v0  ;;  %652 = vmatpush.msra.mxu3 %v302_v2  ;;  %v294_v6 = vld [vmem:[#allocation2 + $0x388] sm:$0xff]  ;;  %p156_p6 = scmp.lt.s32.totalorder %s1487_s18, 7 }
   0xe   : > { %623 = vmatpush.msra.mxu2 %v557_v1  ;;  %v293_v3 = vld [vmem:[#allocation2 + $0x380] sm:$0xff]  ;;  %v286_v10 = vld [vmem:[#allocation2 + $0x348] sm:$0xff]  ;;  %v303_v1 = vld [vmem:[#allocation2 + $0x3d0] sm:$0xff] }
   0xf   : > { %v429_v4 = vld [vmem:[#allocation2 + $0x7c0] sm:$0xff]  ;;  %566 = vmatpush.msra.mxu0 %v293_v3  ;;  %653 = vmatpush.msra.mxu3 %v294_v6  ;;  %v278_v14 = vld [vmem:[#allocation2 + $0x308] sm:$0xff]  ;;  %s1741_s18 = smov (!%p156_p6, %s1487_s18), 7  ;;  %v295_v6 = vld [vmem:[#allocation2 + $0x390] sm:$0xff] }
  0x10   : > { %v549_v5 = vld [vmem:[#allocation2 + $0xb80] sm:$0xff]  ;;  %594 = vmatpush.msra.mxu1 %v429_v4  ;;  %v270_v18 = vld [vmem:[#allocation2 + $0x2c8] sm:$0xff]  ;;  %s1378_s19 = smul.u32 24, %s1741_s18  ;;  %v431_v4 = vld [vmem:[#allocation2 + $0x7d0] sm:$0xff]  ;;  %s1377_s23 = sshll.u32 %s1741_s18, 6 }
  0x11   : > { %v285_v7 = vld [vmem:[#allocation2 + $0x340] sm:$0xff]  ;;  %624 = vmatpush.msra.mxu2 %v549_v5  ;;  %654 = vmatpush.msra.mxu3 %v286_v10  ;;  %v262_v22 = vld [vmem:[#allocation2 + $0x288] sm:$0xff]  ;;  %v287_v10 = vld [vmem:[#allocation2 + $0x350] sm:$0xff]  ;;  %s1596_s26 = scalar_lea.vmem %s1739_s2, %s1377_s23 }
  0x12   : > { %v421_v8 = vld [vmem:[#allocation2 + $0x780] sm:$0xff]  ;;  %567 = vmatpush.msra.mxu0 %v285_v7  ;;  %v254_v26 = vld [vmem:[#allocation2 + $0x248] sm:$0xff]  ;;  %s1499_s22 = scalar_lea.vmem %s1737_s0, %s1378_s19 }
  0x13   : > { %v541_v9 = vld [vmem:[#allocation2 + $0xb40] sm:$0xff]  ;;  %595 = vmatpush.msra.mxu1 %v421_v8  ;;  %655 = vmatpush.msra.mxu3 %v278_v14  ;;  %v246_v30 = vld [vmem:[#allocation2 + $0x208] sm:$0xff]  ;;  %v1505_v0 = vld [vmem:[%s1499_s22 + $0x10] sm:$0xff] }
  0x14   : > { %v277_v11 = vld [vmem:[#allocation2 + $0x300] sm:$0xff]  ;;  %625 = vmatpush.msra.mxu2 %v541_v9  ;;  %v238_v34 = vld [vmem:[#allocation2 + $0x1c8] sm:$0xff]  ;;  %v423_v9 = vld [vmem:[#allocation2 + $0x790] sm:$0xff] }
  0x15   : > { %v413_v12 = vld [vmem:[#allocation2 + $0x740] sm:$0xff]  ;;  %568 = vmatpush.msra.mxu0 %v277_v11  ;;  %656 = vmatpush.msra.mxu3 %v270_v18  ;;  %v230_v38 = vld [vmem:[#allocation2 + $0x188] sm:$0xff]  ;;  %v279_v14 = vld [vmem:[#allocation2 + $0x310] sm:$0xff] }
  0x16   : > { %v533_v13 = vld [vmem:[#allocation2 + $0xb00] sm:$0xff]  ;;  %596 = vmatpush.msra.mxu1 %v413_v12  ;;  %v222_v42 = vld [vmem:[#allocation2 + $0x148] sm:$0xff]  ;;  %v1515_v18 = vld [vmem:[%s1499_s22 + $0x18] sm:$0xff] }
  0x17   : > { %v405_v15 = vld [vmem:[#allocation2 + $0x700] sm:$0xff]  ;;  %626 = vmatpush.msra.mxu2 %v533_v13  ;;  %657 = vmatpush.msra.mxu3 %v262_v22  ;;  %v214_v46 = vld [vmem:[#allocation2 + $0x108] sm:$0xff]  ;;  %v415_v13 = vld [vmem:[#allocation2 + $0x750] sm:$0xff] }
  0x18   : > { %v269_v16 = vld [vmem:[#allocation2 + $0x2c0] sm:$0xff]  ;;  %597 = vmatpush.msra.mxu1 %v405_v15  ;;  %v206_v50 = vld [vmem:[#allocation2 + $0xc8] sm:$0xff] }
  0x19   : > { %v525_v17 = vld [vmem:[#allocation2 + $0xac0] sm:$0xff]  ;;  %569 = vmatpush.msra.mxu0 %v269_v16  ;;  %658 = vmatpush.msra.mxu3 %v254_v26  ;;  %v198_v54 = vld [vmem:[#allocation2 + $0x88] sm:$0xff] }
  0x1a   : > { %v397_v19 = vld [vmem:[#allocation2 + $0x6c0] sm:$0xff]  ;;  %627 = vmatpush.msra.mxu2 %v525_v17  ;;  %v190_v58 = vld [vmem:[#allocation2 + $0x48] sm:$0xff]  ;;  %v407_v17 = vld [vmem:[#allocation2 + $0x710] sm:$0xff] }
  0x1b   : > { %v261_v20 = vld [vmem:[#allocation2 + $0x280] sm:$0xff]  ;;  %598 = vmatpush.msra.mxu1 %v397_v19  ;;  %659 = vmatpush.msra.mxu3 %v246_v30  ;;  %v182_v62 = vld [vmem:[#allocation2 + $0x8] sm:$0xff] }
  0x1c   : > { %v517_v21 = vld [vmem:[#allocation2 + $0xa80] sm:$0xff]  ;;  %570 = vmatpush.msra.mxu0 %v261_v20  ;;  %v430_v3 = vld [vmem:[#allocation2 + $0x7c8] sm:$0xff]  ;;  %v271_v20 = vld [vmem:[#allocation2 + $0x2d0] sm:$0xff] }
  0x1d   : > { %v389_v23 = vld [vmem:[#allocation2 + $0x680] sm:$0xff]  ;;  %628 = vmatpush.msra.mxu2 %v517_v21  ;;  %660 = vmatpush.msra.mxu3 %v238_v34  ;;  %v1511_v5 = vld [vmem:[%s1499_s22 + $0x8] sm:$0xff] }
  0x1e   : > { %v253_v24 = vld [vmem:[#allocation2 + $0x240] sm:$0xff]  ;;  %599 = vmatpush.msra.mxu1 %v389_v23  ;;  %v422_v7 = vld [vmem:[#allocation2 + $0x788] sm:$0xff]  ;;  %v399_v23 = vld [vmem:[#allocation2 + $0x6d0] sm:$0xff] }
  0x1f   : > { %v509_v25 = vld [vmem:[#allocation2 + $0xa40] sm:$0xff]  ;;  %571 = vmatpush.msra.mxu0 %v253_v24  ;;  %661 = vmatpush.msra.mxu3 %v230_v38  ;;  %v558_v8 = vld [vmem:[#allocation2 + $0xbc8] sm:$0xff] }
  0x20   : > { %v381_v27 = vld [vmem:[#allocation2 + $0x640] sm:$0xff]  ;;  %629 = vmatpush.msra.mxu2 %v509_v25  ;;  %v414_v11 = vld [vmem:[#allocation2 + $0x748] sm:$0xff]  ;;  %v263_v25 = vld [vmem:[#allocation2 + $0x290] sm:$0xff] }
  0x21   : > { %v245_v28 = vld [vmem:[#allocation2 + $0x200] sm:$0xff]  ;;  %600 = vmatpush.msra.mxu1 %v381_v27  ;;  %662 = vmatpush.msra.mxu3 %v222_v42  ;;  %v550_v12 = vld [vmem:[#allocation2 + $0xb88] sm:$0xff]  ;;  %v367_v42 = vld [vmem:[#allocation2 + $0x5d0] sm:$0xff] }
  0x22   : > { %v501_v29 = vld [vmem:[#allocation2 + $0xa00] sm:$0xff]  ;;  %572 = vmatpush.msra.mxu0 %v245_v28  ;;  %v406_v15 = vld [vmem:[#allocation2 + $0x708] sm:$0xff]  ;;  %v391_v28 = vld [vmem:[#allocation2 + $0x690] sm:$0xff] }
  0x23   : > { %v373_v31 = vld [vmem:[#allocation2 + $0x600] sm:$0xff]  ;;  %630 = vmatpush.msra.mxu2 %v501_v29  ;;  %663 = vmatpush.msra.mxu3 %v214_v46  ;;  %v542_v16 = vld [vmem:[#allocation2 + $0xb48] sm:$0xff]  ;;  %v255_v29 = vld [vmem:[#allocation2 + $0x250] sm:$0xff] }
  0x24   : > { %v237_v32 = vld [vmem:[#allocation2 + $0x1c0] sm:$0xff]  ;;  %601 = vmatpush.msra.mxu1 %v373_v31  ;;  %v1518_v19 = vld [vmem:[%s1499_s22 + $0x28] sm:$0xff] }
  0x25   : > { %v493_v33 = vld [vmem:[#allocation2 + $0x9c0] sm:$0xff]  ;;  %573 = vmatpush.msra.mxu0 %v237_v32  ;;  %664 = vmatpush.msra.mxu3 %v206_v50  ;;  %v398_v21 = vld [vmem:[#allocation2 + $0x6c8] sm:$0xff]  ;;  %v383_v32 = vld [vmem:[#allocation2 + $0x650] sm:$0xff] }
  0x26   : > { %v365_v35 = vld [vmem:[#allocation2 + $0x5c0] sm:$0xff]  ;;  %631 = vmatpush.msra.mxu2 %v493_v33  ;;  %v534_v22 = vld [vmem:[#allocation2 + $0xb08] sm:$0xff]  ;;  %v247_v33 = vld [vmem:[#allocation2 + $0x210] sm:$0xff] }
  0x27   : > { %v229_v36 = vld [vmem:[#allocation2 + $0x180] sm:$0xff]  ;;  %602 = vmatpush.msra.mxu1 %v365_v35  ;;  %665 = vmatpush.msra.mxu3 %v198_v54  ;;  %v390_v26 = vld [vmem:[#allocation2 + $0x688] sm:$0xff] }
  0x28   : > { %v485_v37 = vld [vmem:[#allocation2 + $0x980] sm:$0xff]  ;;  %574 = vmatpush.msra.mxu0 %v229_v36  ;;  %v526_v27 = vld [vmem:[#allocation2 + $0xac8] sm:$0xff]  ;;  %v375_v36 = vld [vmem:[#allocation2 + $0x610] sm:$0xff] }
  0x29   : > { %v357_v39 = vld [vmem:[#allocation2 + $0x580] sm:$0xff]  ;;  %632 = vmatpush.msra.mxu2 %v485_v37  ;;  %666 = vmatpush.msra.mxu3 %v190_v58  ;;  %v382_v30 = vld [vmem:[#allocation2 + $0x648] sm:$0xff]  ;;  %v1528_v37 = vld [vmem:[%s1499_s22 + $0x30] sm:$0xff] }
  0x2a   : > { %v221_v40 = vld [vmem:[#allocation2 + $0x140] sm:$0xff]  ;;  %603 = vmatpush.msra.mxu1 %v357_v39  ;;  %v518_v31 = vld [vmem:[#allocation2 + $0xa88] sm:$0xff]  ;;  %v239_v39 = vld [vmem:[#allocation2 + $0x1d0] sm:$0xff] }
  0x2b   : > { %v477_v41 = vld [vmem:[#allocation2 + $0x940] sm:$0xff]  ;;  %575 = vmatpush.msra.mxu0 %v221_v40  ;;  %667 = vmatpush.msra.mxu3 %v182_v62  ;;  %v374_v34 = vld [vmem:[#allocation2 + $0x608] sm:$0xff]  ;;  %v207_v58 = vld [vmem:[#allocation2 + $0xd0] sm:$0xff] }
  0x2c   : > { %v349_v43 = vld [vmem:[#allocation2 + $0x540] sm:$0xff]  ;;  %633 = vmatpush.msra.mxu2 %v477_v41  ;;  %v510_v35 = vld [vmem:[#allocation2 + $0xa48] sm:$0xff]  ;;  %v1550_v62 = vld [vmem:[%s1499_s22 + $0x50] sm:$0xff] }
  0x2d   : > { %v213_v44 = vld [vmem:[#allocation2 + $0x100] sm:$0xff]  ;;  %604 = vmatpush.msra.mxu1 %v349_v43  ;;  %768 = vmatpush.msrb.mxu3 %v431_v4  ;;  %v366_v40 = vld [vmem:[#allocation2 + $0x5c8] sm:$0xff]  ;;  %v1537_v43 = vld [vmem:[%s1499_s22 + $0x38] sm:$0xff] }
  0x2e   : > { %v469_v45 = vld [vmem:[#allocation2 + $0x900] sm:$0xff]  ;;  %576 = vmatpush.msra.mxu0 %v213_v44  ;;  %v502_v41 = vld [vmem:[#allocation2 + $0xa08] sm:$0xff]  ;;  %v231_v44 = vld [vmem:[#allocation2 + $0x190] sm:$0xff] }
  0x2f   : > { %v341_v47 = vld [vmem:[#allocation2 + $0x500] sm:$0xff]  ;;  %634 = vmatpush.msra.mxu2 %v469_v45  ;;  %769 = vmatpush.msrb.mxu3 %v423_v9  ;;  %v358_v45 = vld [vmem:[#allocation2 + $0x588] sm:$0xff]  ;;  %v327_v4 = vld [vmem:[#allocation2 + $0x490] sm:$0xff] }
  0x30   : > { %v205_v48 = vld [vmem:[#allocation2 + $0xc0] sm:$0xff]  ;;  %605 = vmatpush.msra.mxu1 %v341_v47  ;;  %v494_v46 = vld [vmem:[#allocation2 + $0x9c8] sm:$0xff]  ;;  %v359_v47 = vld [vmem:[#allocation2 + $0x590] sm:$0xff] }
  0x31   : > { %v461_v49 = vld [vmem:[#allocation2 + $0x8c0] sm:$0xff]  ;;  %577 = vmatpush.msra.mxu0 %v205_v48  ;;  %770 = vmatpush.msrb.mxu3 %v415_v13  ;;  %v223_v48 = vld [vmem:[#allocation2 + $0x150] sm:$0xff]  ;;  %v486_v50 = vld [vmem:[#allocation2 + $0x988] sm:$0xff] }
  0x32   : > { %v333_v51 = vld [vmem:[#allocation2 + $0x4c0] sm:$0xff]  ;;  %635 = vmatpush.msra.mxu2 %v461_v49  ;;  %v350_v49 = vld [vmem:[#allocation2 + $0x548] sm:$0xff]  ;;  %v319_v9 = vld [vmem:[#allocation2 + $0x450] sm:$0xff] }
  0x33   : > { %v197_v52 = vld [vmem:[#allocation2 + $0x80] sm:$0xff]  ;;  %606 = vmatpush.msra.mxu1 %v333_v51  ;;  %771 = vmatpush.msrb.mxu3 %v407_v17  ;;  %v351_v51 = vld [vmem:[#allocation2 + $0x550] sm:$0xff]  ;;  %v478_v54 = vld [vmem:[#allocation2 + $0x948] sm:$0xff] }
  0x34   : > { %v453_v53 = vld [vmem:[#allocation2 + $0x880] sm:$0xff]  ;;  %578 = vmatpush.msra.mxu0 %v197_v52  ;;  %v215_v52 = vld [vmem:[#allocation2 + $0x110] sm:$0xff]  ;;  %v560_v17 = vld [vmem:[#allocation2 + $0xbd8] sm:$0xff] }
  0x35   : > { %v325_v55 = vld [vmem:[#allocation2 + $0x480] sm:$0xff]  ;;  %636 = vmatpush.msra.mxu2 %v453_v53  ;;  %772 = vmatpush.msrb.mxu3 %v399_v23  ;;  %v342_v53 = vld [vmem:[#allocation2 + $0x508] sm:$0xff]  ;;  %v311_v13 = vld [vmem:[#allocation2 + $0x410] sm:$0xff] }
  0x36   : > { %v189_v56 = vld [vmem:[#allocation2 + $0x40] sm:$0xff]  ;;  %607 = vmatpush.msra.mxu1 %v325_v55  ;;  %v343_v55 = vld [vmem:[#allocation2 + $0x510] sm:$0xff]  ;;  %v552_v23 = vld [vmem:[#allocation2 + $0xb98] sm:$0xff] }
  0x37   : > { %v445_v57 = vld [vmem:[#allocation2 + $0x840] sm:$0xff]  ;;  %579 = vmatpush.msra.mxu0 %v189_v56  ;;  %773 = vmatpush.msrb.mxu3 %v391_v28  ;;  %v1541_v56 = vld [vmem:[%s1499_s22 + $0x48] sm:$0xff]  ;;  %v544_v28 = vld [vmem:[#allocation2 + $0xb58] sm:$0xff] }
  0x38   : > { %v317_v59 = vld [vmem:[#allocation2 + $0x440] sm:$0xff]  ;;  %637 = vmatpush.msra.mxu2 %v445_v57  ;;  %v1544_v57 = vld [vmem:[%s1499_s22 + $0x58] sm:$0xff] }
  0x39   : > { %v181_v60 = vld [vmem:[#allocation2] sm:$0xff]  ;;  %608 = vmatpush.msra.mxu1 %v317_v59  ;;  %774 = vmatpush.msrb.mxu3 %v383_v32  ;;  %v334_v59 = vld [vmem:[#allocation2 + $0x4c8] sm:$0xff]  ;;  %v536_v32 = vld [vmem:[#allocation2 + $0xb18] sm:$0xff] }
  0x3a   : > { %v437_v61 = vld [vmem:[#allocation2 + $0x800] sm:$0xff]  ;;  %580 = vmatpush.msra.mxu0 %v181_v60  ;;  %v470_v60 = vld [vmem:[#allocation2 + $0x908] sm:$0xff] }
  0x3b   : > { %v1502_v63 = vld [vmem:[%s1499_s22] sm:$0xff]  ;;  %638 = vmatpush.msra.mxu2 %v437_v61  ;;  %775 = vmatpush.msrb.mxu3 %v375_v36  ;;  %v335_v61 = vld [vmem:[#allocation2 + $0x4d0] sm:$0xff]  ;;  %v528_v36 = vld [vmem:[#allocation2 + $0xad8] sm:$0xff] }
  0x3c   : > { %v309_v2 = vld [vmem:[#allocation2 + $0x400] sm:$0xff]  ;;  %581 = vmatmul.f32.vlgmr.msra.gmra.mxu0 %v1502_v63  ;;  %639 = vmatmul.f32.vlgmr.msra.gmra.mxu2 %v1505_v0 }
  0x3d   : > { %668 = vmatmul.f32.vlgmr.msra.gmra.mxu3 %v1502_v63  ;;  %739 = vmatpush.msrb.mxu2 %v303_v1  ;;  %v1524_v24 = vld [vmem:[%s1499_s22 + $0x20] sm:$0xff]  ;;  %v199_v1 = vld [vmem:[#allocation2 + $0x90] sm:$0xff] }
  0x3e   : > { %609 = vmatpush.msra.mxu1 %v309_v2  ;;  %681 = vmatpush.msrb.mxu0 %v430_v3  ;;  %v1531_v38 = vld [vmem:[%s1499_s22 + $0x40] sm:$0xff]  ;;  %v326_v2 = vld [vmem:[#allocation2 + $0x488] sm:$0xff] }
  0x3f   : > { %610 = vmatmul.f32.vlgmr.msra.gmra.mxu1 %v1511_v5  ;;  %740 = vmatpush.msrb.mxu2 %v295_v6  ;;  %v462_v3 = vld [vmem:[#allocation2 + $0x8c8] sm:$0xff]  ;;  %v191_v6 = vld [vmem:[#allocation2 + $0x50] sm:$0xff] }
  0x40   : > { %682 = vmatpush.msrb.mxu0 %v422_v7  ;;  %710 = vmatpush.msrb.mxu1 %v558_v8  ;;  %v318_v7 = vld [vmem:[#allocation2 + $0x448] sm:$0xff] }
  0x41   : > { %741 = vmatpush.msrb.mxu2 %v287_v10  ;;  %776 = vmatpush.msrb.mxu3 %v367_v42  ;;  %v454_v8 = vld [vmem:[#allocation2 + $0x888] sm:$0xff]  ;;  %v183_v10 = vld [vmem:[#allocation2 + $0x10] sm:$0xff]  ;;  %v520_v42 = vld [vmem:[#allocation2 + $0xa98] sm:$0xff] }
  0x42   : > { %683 = vmatpush.msrb.mxu0 %v414_v11  ;;  %711 = vmatpush.msrb.mxu1 %v550_v12  ;;  %v310_v11 = vld [vmem:[#allocation2 + $0x408] sm:$0xff] }
  0x43   : > { %742 = vmatpush.msrb.mxu2 %v279_v14  ;;  %777 = vmatpush.msrb.mxu3 %v359_v47  ;;  %v446_v12 = vld [vmem:[#allocation2 + $0x848] sm:$0xff]  ;;  %v432_v14 = vld [vmem:[#allocation2 + $0x7d8] sm:$0xff] }
  0x44   : > { %684 = vmatpush.msrb.mxu0 %v406_v15  ;;  %712 = vmatpush.msrb.mxu1 %v542_v16  ;;  %v438_v15 = vld [vmem:[#allocation2 + $0x808] sm:$0xff]  ;;  %v559_v16 = vld [vmem:[#allocation2 + $0xbd0] sm:$0xff]  ;;  %v512_v47 = vld [vmem:[#allocation2 + $0xa58] sm:$0xff] }
  0x45   : > { %584 = vmatmul.f32.gmra.mxu0 %v1515_v18  ;;  %642 = vmatmul.f32.gmra.mxu2 %v1518_v19 }
  0x46   : > { %671 = vmatmul.f32.gmra.mxu3 %v1515_v18  ;;  %743 = vmatpush.msrb.mxu2 %v271_v20  ;;  %v424_v20 = vld [vmem:[#allocation2 + $0x798] sm:$0xff] }
  0x47   : > { %685 = vmatpush.msrb.mxu0 %v398_v21  ;;  %713 = vmatpush.msrb.mxu1 %v534_v22  ;;  %v551_v21 = vld [vmem:[#allocation2 + $0xb90] sm:$0xff]  ;;  %v304_v22 = vld [vmem:[#allocation2 + $0x3d8] sm:$0xff] }
  0x48   : > { %613 = vmatmul.f32.gmra.mxu1 %v1524_v24  ;;  %744 = vmatpush.msrb.mxu2 %v263_v25  ;;  %v416_v25 = vld [vmem:[#allocation2 + $0x758] sm:$0xff] }
  0x49   : > { %686 = vmatpush.msrb.mxu0 %v390_v26  ;;  %714 = vmatpush.msrb.mxu1 %v526_v27  ;;  %v543_v26 = vld [vmem:[#allocation2 + $0xb50] sm:$0xff]  ;;  %v296_v27 = vld [vmem:[#allocation2 + $0x398] sm:$0xff] }
  0x4a   : > { %745 = vmatpush.msrb.mxu2 %v255_v29  ;;  %778 = vmatpush.msrb.mxu3 %v351_v51  ;;  %v408_v29 = vld [vmem:[#allocation2 + $0x718] sm:$0xff] }
  0x4b   : > { %687 = vmatpush.msrb.mxu0 %v382_v30  ;;  %715 = vmatpush.msrb.mxu1 %v518_v31  ;;  %v535_v30 = vld [vmem:[#allocation2 + $0xb10] sm:$0xff]  ;;  %v288_v31 = vld [vmem:[#allocation2 + $0x358] sm:$0xff] }
  0x4c   : > { %746 = vmatpush.msrb.mxu2 %v247_v33  ;;  %779 = vmatpush.msrb.mxu3 %v343_v55  ;;  %v400_v33 = vld [vmem:[#allocation2 + $0x6d8] sm:$0xff] }
  0x4d   : > { %688 = vmatpush.msrb.mxu0 %v374_v34  ;;  %716 = vmatpush.msrb.mxu1 %v510_v35  ;;  %v527_v34 = vld [vmem:[#allocation2 + $0xad0] sm:$0xff]  ;;  %v280_v35 = vld [vmem:[#allocation2 + $0x318] sm:$0xff] }
  0x4e   : > { %587 = vmatmul.f32.gmra.mxu0 %v1528_v37  ;;  %645 = vmatmul.f32.gmra.mxu2 %v1531_v38  ;;  %v504_v51 = vld [vmem:[#allocation2 + $0xa18] sm:$0xff] }
  0x4f   : > { %674 = vmatmul.f32.gmra.mxu3 %v1528_v37  ;;  %747 = vmatpush.msrb.mxu2 %v239_v39  ;;  %v392_v39 = vld [vmem:[#allocation2 + $0x698] sm:$0xff] }
  0x50   : > { %689 = vmatpush.msrb.mxu0 %v366_v40  ;;  %717 = vmatpush.msrb.mxu1 %v502_v41  ;;  %v519_v40 = vld [vmem:[#allocation2 + $0xa90] sm:$0xff]  ;;  %v272_v41 = vld [vmem:[#allocation2 + $0x2d8] sm:$0xff] }
  0x51   : > { %616 = vmatmul.f32.gmra.mxu1 %v1537_v43  ;;  %748 = vmatpush.msrb.mxu2 %v231_v44  ;;  %v384_v44 = vld [vmem:[#allocation2 + $0x658] sm:$0xff] }
  0x52   : > { %690 = vmatpush.msrb.mxu0 %v358_v45  ;;  %718 = vmatpush.msrb.mxu1 %v494_v46  ;;  %v511_v45 = vld [vmem:[#allocation2 + $0xa50] sm:$0xff]  ;;  %v264_v46 = vld [vmem:[#allocation2 + $0x298] sm:$0xff] }
  0x53   : > { %749 = vmatpush.msrb.mxu2 %v223_v48  ;;  %780 = vmatpush.msrb.mxu3 %v335_v61  ;;  %v376_v48 = vld [vmem:[#allocation2 + $0x618] sm:$0xff] }
  0x54   : > { %691 = vmatpush.msrb.mxu0 %v350_v49  ;;  %719 = vmatpush.msrb.mxu1 %v486_v50  ;;  %v503_v49 = vld [vmem:[#allocation2 + $0xa10] sm:$0xff]  ;;  %v256_v50 = vld [vmem:[#allocation2 + $0x258] sm:$0xff] }
  0x55   : > { %750 = vmatpush.msrb.mxu2 %v215_v52  ;;  %781 = vmatpush.msrb.mxu3 %v327_v4  ;;  %v368_v52 = vld [vmem:[#allocation2 + $0x5d8] sm:$0xff] }
  0x56   : > { %692 = vmatpush.msrb.mxu0 %v342_v53  ;;  %720 = vmatpush.msrb.mxu1 %v478_v54  ;;  %v495_v53 = vld [vmem:[#allocation2 + $0x9d0] sm:$0xff]  ;;  %v248_v54 = vld [vmem:[#allocation2 + $0x218] sm:$0xff] }
  0x57   : > { %590 = vmatmul.f32.gmra.mxu0 %v1541_v56  ;;  %648 = vmatmul.f32.gmra.mxu2 %v1544_v57  ;;  %v496_v55 = vld [vmem:[#allocation2 + $0x9d8] sm:$0xff] }
  0x58   : > { %677 = vmatmul.f32.gmra.mxu3 %v1541_v56  ;;  %751 = vmatpush.msrb.mxu2 %v207_v58  ;;  %v360_v58 = vld [vmem:[#allocation2 + $0x598] sm:$0xff] }
  0x59   : > { %693 = vmatpush.msrb.mxu0 %v334_v59  ;;  %721 = vmatpush.msrb.mxu1 %v470_v60  ;;  %v487_v59 = vld [vmem:[#allocation2 + $0x990] sm:$0xff]  ;;  %v240_v60 = vld [vmem:[#allocation2 + $0x1d8] sm:$0xff] }
  0x5a   : > { %619 = vmatmul.f32.gmra.mxu1 %v1550_v62  ;;  %752 = vmatpush.msrb.mxu2 %v199_v1  ;;  %v488_v61 = vld [vmem:[#allocation2 + $0x998] sm:$0xff] }
  0x5b   : > { %694 = vmatpush.msrb.mxu0 %v326_v2  ;;  %722 = vmatpush.msrb.mxu1 %v462_v3  ;;  %v352_v1 = vld [vmem:[#allocation2 + $0x558] sm:$0xff]  ;;  %v479_v2 = vld [vmem:[#allocation2 + $0x950] sm:$0xff] }
  0x5c   : > { %753 = vmatpush.msrb.mxu2 %v191_v6  ;;  %782 = vmatpush.msrb.mxu3 %v319_v9  ;;  %v232_v3 = vld [vmem:[#allocation2 + $0x198] sm:$0xff] }
  0x5d   : > { %695 = vmatpush.msrb.mxu0 %v318_v7  ;;  %723 = vmatpush.msrb.mxu1 %v454_v8  ;;  %v480_v4 = vld [vmem:[#allocation2 + $0x958] sm:$0xff]  ;;  %v471_v7 = vld [vmem:[#allocation2 + $0x910] sm:$0xff] }
  0x5e   : > { %754 = vmatpush.msrb.mxu2 %v183_v10  ;;  %783 = vmatpush.msrb.mxu3 %v311_v13  ;;  %v344_v6 = vld [vmem:[#allocation2 + $0x518] sm:$0xff] }
  0x5f   : > { %696 = vmatpush.msrb.mxu0 %v310_v11  ;;  %724 = vmatpush.msrb.mxu1 %v446_v12  ;;  %v224_v8 = vld [vmem:[#allocation2 + $0x158] sm:$0xff]  ;;  %v463_v11 = vld [vmem:[#allocation2 + $0x8d0] sm:$0xff] }
  0x60   : > { %697 = vmatmul.f32.vlgmr.msrb.gmra.mxu0 %v1511_v5  ;;  %755 = vmatmul.f32.vlgmr.msrb.gmra.mxu2 %v1502_v63  ;;  %v472_v9 = vld [vmem:[#allocation2 + $0x918] sm:$0xff] }
  0x61   : > { %784 = vmatmul.f32.vlgmr.msrb.gmra.mxu3 %v1511_v5  ;;  %855 = vmatpush.msra.mxu2 %v432_v14  ;;  %v336_v10 = vld [vmem:[#allocation2 + $0x4d8] sm:$0xff] }
  0x62   : > { %725 = vmatpush.msrb.mxu1 %v438_v15  ;;  %797 = vmatpush.msra.mxu0 %v559_v16  ;;  %v216_v12 = vld [vmem:[#allocation2 + $0x118] sm:$0xff]  ;;  %v455_v15 = vld [vmem:[#allocation2 + $0x890] sm:$0xff] }
  0x63   : > { %884 = vmatpush.msra.mxu3 %v560_v17  ;;  %726 = vmatmul.f32.vlgmr.msrb.gmra.mxu1 %v1505_v0  ;;  %v464_v13 = vld [vmem:[#allocation2 + $0x8d8] sm:$0xff] }
  0x64   : > { %856 = vmatpush.msra.mxu2 %v424_v20  ;;  %798 = vmatpush.msra.mxu0 %v551_v21  ;;  %v328_v14 = vld [vmem:[#allocation2 + $0x498] sm:$0xff]  ;;  %v447_v21 = vld [vmem:[#allocation2 + $0x850] sm:$0xff] }
  0x65   : > { %826 = vmatpush.msra.mxu1 %v304_v22  ;;  %885 = vmatpush.msra.mxu3 %v552_v23  ;;  %v208_v16 = vld [vmem:[#allocation2 + $0xd8] sm:$0xff] }
  0x66   : > { %857 = vmatpush.msra.mxu2 %v416_v25  ;;  %799 = vmatpush.msra.mxu0 %v543_v26  ;;  %v456_v17 = vld [vmem:[#allocation2 + $0x898] sm:$0xff]  ;;  %v439_v26 = vld [vmem:[#allocation2 + $0x810] sm:$0xff] }
  0x67   : > { %827 = vmatpush.msra.mxu1 %v296_v27  ;;  %886 = vmatpush.msra.mxu3 %v544_v28  ;;  %v320_v20 = vld [vmem:[#allocation2 + $0x458] sm:$0xff] }
  0x68   : > { %858 = vmatpush.msra.mxu2 %v408_v29  ;;  %800 = vmatpush.msra.mxu0 %v535_v30  ;;  %v200_v22 = vld [vmem:[#allocation2 + $0x98] sm:$0xff]  ;;  %v561_v29 = vld [vmem:[#allocation2 + $0xbe0] sm:$0xff] }
  0x69   : > { %828 = vmatpush.msra.mxu1 %v288_v31  ;;  %887 = vmatpush.msra.mxu3 %v536_v32  ;;  %v448_v23 = vld [vmem:[#allocation2 + $0x858] sm:$0xff]  ;;  %v305_v31 = vld [vmem:[#allocation2 + $0x3e0] sm:$0xff]  ;;  %v306_v32 = vld [vmem:[#allocation2 + $0x3e8] sm:$0xff] }
  0x6a   : > { %700 = vmatmul.f32.gmra.mxu0 %v1524_v24  ;;  %758 = vmatmul.f32.gmra.mxu2 %v1515_v18  ;;  %v312_v25 = vld [vmem:[#allocation2 + $0x418] sm:$0xff] }
  0x6b   : > { %787 = vmatmul.f32.gmra.mxu3 %v1524_v24  ;;  %859 = vmatpush.msra.mxu2 %v400_v33  ;;  %v192_v27 = vld [vmem:[#allocation2 + $0x58] sm:$0xff]  ;;  %v553_v33 = vld [vmem:[#allocation2 + $0xba0] sm:$0xff] }
  0x6c   : > { %801 = vmatpush.msra.mxu0 %v527_v34  ;;  %829 = vmatpush.msra.mxu1 %v280_v35  ;;  %v440_v28 = vld [vmem:[#allocation2 + $0x818] sm:$0xff]  ;;  %v297_v34 = vld [vmem:[#allocation2 + $0x3a0] sm:$0xff] }
  0x6d   : > { %888 = vmatpush.msra.mxu3 %v528_v36  ;;  %729 = vmatmul.f32.gmra.mxu1 %v1518_v19  ;;  %v184_v30 = vld [vmem:[#allocation2 + $0x18] sm:$0xff]  ;;  %v433_v35 = vld [vmem:[#allocation2 + $0x7e0] sm:$0xff]  ;;  %v298_v36 = vld [vmem:[#allocation2 + $0x3a8] sm:$0xff] }
  0x6e   : > { %860 = vmatpush.msra.mxu2 %v392_v39  ;;  %802 = vmatpush.msra.mxu0 %v519_v40  ;;  %v545_v39 = vld [vmem:[#allocation2 + $0xb60] sm:$0xff] }
  0x6f   : > { %830 = vmatpush.msra.mxu1 %v272_v41  ;;  %889 = vmatpush.msra.mxu3 %v520_v42  ;;  %v289_v40 = vld [vmem:[#allocation2 + $0x360] sm:$0xff]  ;;  %v290_v42 = vld [vmem:[#allocation2 + $0x368] sm:$0xff] }
  0x70   : > { %861 = vmatpush.msra.mxu2 %v384_v44  ;;  %803 = vmatpush.msra.mxu0 %v511_v45  ;;  %v425_v41 = vld [vmem:[#allocation2 + $0x7a0] sm:$0xff] }
  0x71   : > { %831 = vmatpush.msra.mxu1 %v264_v46  ;;  %890 = vmatpush.msra.mxu3 %v512_v47  ;;  %v537_v44 = vld [vmem:[#allocation2 + $0xb20] sm:$0xff]  ;;  %v282_v47 = vld [vmem:[#allocation2 + $0x328] sm:$0xff] }
  0x72   : > { %862 = vmatpush.msra.mxu2 %v376_v48  ;;  %804 = vmatpush.msra.mxu0 %v503_v49  ;;  %v281_v45 = vld [vmem:[#allocation2 + $0x320] sm:$0xff] }
  0x73   : > { %832 = vmatpush.msra.mxu1 %v256_v50  ;;  %891 = vmatpush.msra.mxu3 %v504_v51  ;;  %v417_v46 = vld [vmem:[#allocation2 + $0x760] sm:$0xff]  ;;  %v274_v51 = vld [vmem:[#allocation2 + $0x2e8] sm:$0xff] }
  0x74   : > { %703 = vmatmul.f32.gmra.mxu0 %v1537_v43  ;;  %761 = vmatmul.f32.gmra.mxu2 %v1528_v37  ;;  %v529_v48 = vld [vmem:[#allocation2 + $0xae0] sm:$0xff] }
  0x75   : > { %790 = vmatmul.f32.gmra.mxu3 %v1537_v43  ;;  %863 = vmatpush.msra.mxu2 %v368_v52  ;;  %v273_v49 = vld [vmem:[#allocation2 + $0x2e0] sm:$0xff] }
  0x76   : > { %805 = vmatpush.msra.mxu0 %v495_v53  ;;  %833 = vmatpush.msra.mxu1 %v248_v54  ;;  %v409_v50 = vld [vmem:[#allocation2 + $0x720] sm:$0xff] }
  0x77   : > { %892 = vmatpush.msra.mxu3 %v496_v55  ;;  %732 = vmatmul.f32.gmra.mxu1 %v1531_v38  ;;  %v521_v52 = vld [vmem:[#allocation2 + $0xaa0] sm:$0xff]  ;;  %v266_v55 = vld [vmem:[#allocation2 + $0x2a8] sm:$0xff] }
  0x78   : > { %864 = vmatpush.msra.mxu2 %v360_v58  ;;  %806 = vmatpush.msra.mxu0 %v487_v59  ;;  %v265_v53 = vld [vmem:[#allocation2 + $0x2a0] sm:$0xff] }
  0x79   : > { %834 = vmatpush.msra.mxu1 %v240_v60  ;;  %893 = vmatpush.msra.mxu3 %v488_v61  ;;  %v401_v54 = vld [vmem:[#allocation2 + $0x6e0] sm:$0xff]  ;;  %v258_v61 = vld [vmem:[#allocation2 + $0x268] sm:$0xff] }
  0x7a   : > { %865 = vmatpush.msra.mxu2 %v352_v1  ;;  %807 = vmatpush.msra.mxu0 %v479_v2  ;;  %v513_v58 = vld [vmem:[#allocation2 + $0xa60] sm:$0xff] }
  0x7b   : > { %835 = vmatpush.msra.mxu1 %v232_v3  ;;  %894 = vmatpush.msra.mxu3 %v480_v4  ;;  %v257_v59 = vld [vmem:[#allocation2 + $0x260] sm:$0xff]  ;;  %v250_v4 = vld [vmem:[#allocation2 + $0x228] sm:$0xff] }
  0x7c   : > { %866 = vmatpush.msra.mxu2 %v344_v6  ;;  %808 = vmatpush.msra.mxu0 %v471_v7  ;;  %v393_v60 = vld [vmem:[#allocation2 + $0x6a0] sm:$0xff] }
  0x7d   : > { %836 = vmatpush.msra.mxu1 %v224_v8  ;;  %895 = vmatpush.msra.mxu3 %v472_v9  ;;  %v505_v1 = vld [vmem:[#allocation2 + $0xa20] sm:$0xff]  ;;  %v242_v9 = vld [vmem:[#allocation2 + $0x1e8] sm:$0xff] }
  0x7e   : > { %706 = vmatmul.f32.gmra.mxu0 %v1550_v62  ;;  %764 = vmatmul.f32.gmra.mxu2 %v1541_v56  ;;  %v249_v2 = vld [vmem:[#allocation2 + $0x220] sm:$0xff] }
  0x7f   : > { %793 = vmatmul.f32.gmra.mxu3 %v1550_v62  ;;  %867 = vmatpush.msra.mxu2 %v336_v10  ;;  %v385_v3 = vld [vmem:[#allocation2 + $0x660] sm:$0xff] }
  0x80   : > { %809 = vmatpush.msra.mxu0 %v463_v11  ;;  %837 = vmatpush.msra.mxu1 %v216_v12  ;;  %v497_v6 = vld [vmem:[#allocation2 + $0x9e0] sm:$0xff] }
  0x81   : > { %896 = vmatpush.msra.mxu3 %v464_v13  ;;  %735 = vmatmul.f32.gmra.mxu1 %v1544_v57  ;;  %v241_v7 = vld [vmem:[#allocation2 + $0x1e0] sm:$0xff]  ;;  %v234_v13 = vld [vmem:[#allocation2 + $0x1a8] sm:$0xff] }
  0x82   : > { %868 = vmatpush.msra.mxu2 %v328_v14  ;;  %810 = vmatpush.msra.mxu0 %v455_v15  ;;  %v377_v8 = vld [vmem:[#allocation2 + $0x620] sm:$0xff] }
  0x83   : > { %838 = vmatpush.msra.mxu1 %v208_v16  ;;  %897 = vmatpush.msra.mxu3 %v456_v17  ;;  %v489_v10 = vld [vmem:[#allocation2 + $0x9a0] sm:$0xff]  ;;  %v226_v17 = vld [vmem:[#allocation2 + $0x168] sm:$0xff] }
  0x84   : > { %869 = vmatpush.msra.mxu2 %v320_v20  ;;  %811 = vmatpush.msra.mxu0 %v447_v21  ;;  %v233_v11 = vld [vmem:[#allocation2 + $0x1a0] sm:$0xff] }
  0x85   : > { %839 = vmatpush.msra.mxu1 %v200_v22  ;;  %898 = vmatpush.msra.mxu3 %v448_v23  ;;  %v369_v12 = vld [vmem:[#allocation2 + $0x5e0] sm:$0xff]  ;;  %v218_v23 = vld [vmem:[#allocation2 + $0x128] sm:$0xff] }
  0x86   : > { %870 = vmatpush.msra.mxu2 %v312_v25  ;;  %812 = vmatpush.msra.mxu0 %v439_v26  ;;  %v481_v14 = vld [vmem:[#allocation2 + $0x960] sm:$0xff] }
  0x87   : > { %840 = vmatpush.msra.mxu1 %v192_v27  ;;  %899 = vmatpush.msra.mxu3 %v440_v28  ;;  %v225_v15 = vld [vmem:[#allocation2 + $0x160] sm:$0xff]  ;;  %v210_v28 = vld [vmem:[#allocation2 + $0xe8] sm:$0xff] }
  0x88   : > { %813 = vmatmul.f32.vlgmr.msra.gmra.mxu0 %v1505_v0  ;;  %871 = vmatmul.f32.vlgmr.msra.gmra.mxu2 %v1511_v5  ;;  %v361_v16 = vld [vmem:[#allocation2 + $0x5a0] sm:$0xff] }
  0x89   : > { %900 = vmatmul.f32.vlgmr.msra.gmra.mxu3 %v1505_v0  ;;  %971 = vmatpush.msrb.mxu2 %v561_v29  ;;  %v473_v20 = vld [vmem:[#allocation2 + $0x920] sm:$0xff] }
  0x8a   : > { %841 = vmatpush.msra.mxu1 %v184_v30  ;;  %913 = vmatpush.msrb.mxu0 %v305_v31  ;;  %v217_v21 = vld [vmem:[#allocation2 + $0x120] sm:$0xff] }
  0x8b   : > { %1000 = vmatpush.msrb.mxu3 %v306_v32  ;;  %842 = vmatmul.f32.vlgmr.msra.gmra.mxu1 %v1502_v63  ;;  %v353_v22 = vld [vmem:[#allocation2 + $0x560] sm:$0xff]  ;;  %v202_v32 = vld [vmem:[#allocation2 + $0xa8] sm:$0xff] }
  0x8c   : > { %972 = vmatpush.msrb.mxu2 %v553_v33  ;;  %914 = vmatpush.msrb.mxu0 %v297_v34  ;;  %v465_v25 = vld [vmem:[#allocation2 + $0x8e0] sm:$0xff] }
  0x8d   : > { %942 = vmatpush.msrb.mxu1 %v433_v35  ;;  %1001 = vmatpush.msrb.mxu3 %v298_v36  ;;  %v209_v26 = vld [vmem:[#allocation2 + $0xe0] sm:$0xff]  ;;  %v194_v36 = vld [vmem:[#allocation2 + $0x68] sm:$0xff] }
  0x8e   : > { %973 = vmatpush.msrb.mxu2 %v545_v39  ;;  %915 = vmatpush.msrb.mxu0 %v289_v40  ;;  %v345_v27 = vld [vmem:[#allocation2 + $0x520] sm:$0xff] }
  0x8f   : > { %943 = vmatpush.msrb.mxu1 %v425_v41  ;;  %1002 = vmatpush.msrb.mxu3 %v290_v42  ;;  %v457_v29 = vld [vmem:[#allocation2 + $0x8a0] sm:$0xff]  ;;  %v186_v42 = vld [vmem:[#allocation2 + $0x28] sm:$0xff] }
  0x90   : > { %974 = vmatpush.msrb.mxu2 %v537_v44  ;;  %916 = vmatpush.msrb.mxu0 %v281_v45  ;;  %v201_v30 = vld [vmem:[#allocation2 + $0xa0] sm:$0xff]  ;;  %v307_v44 = vld [vmem:[#allocation2 + $0x3f0] sm:$0xff] }
  0x91   : > { %944 = vmatpush.msrb.mxu1 %v417_v46  ;;  %1003 = vmatpush.msrb.mxu3 %v282_v47  ;;  %v337_v31 = vld [vmem:[#allocation2 + $0x4e0] sm:$0xff]  ;;  %v434_v46 = vld [vmem:[#allocation2 + $0x7e8] sm:$0xff]  ;;  %v435_v47 = vld [vmem:[#allocation2 + $0x7f0] sm:$0xff] }
  0x92   : > { %816 = vmatmul.f32.gmra.mxu0 %v1518_v19  ;;  %874 = vmatmul.f32.gmra.mxu2 %v1524_v24  ;;  %v449_v33 = vld [vmem:[#allocation2 + $0x860] sm:$0xff] }
  0x93   : > { %903 = vmatmul.f32.gmra.mxu3 %v1518_v19  ;;  %975 = vmatpush.msrb.mxu2 %v529_v48  ;;  %v193_v34 = vld [vmem:[#allocation2 + $0x60] sm:$0xff]  ;;  %v299_v48 = vld [vmem:[#allocation2 + $0x3b0] sm:$0xff] }
  0x94   : > { %917 = vmatpush.msrb.mxu0 %v273_v49  ;;  %945 = vmatpush.msrb.mxu1 %v409_v50  ;;  %v329_v35 = vld [vmem:[#allocation2 + $0x4a0] sm:$0xff]  ;;  %v426_v49 = vld [vmem:[#allocation2 + $0x7a8] sm:$0xff] }
  0x95   : > { %1004 = vmatpush.msrb.mxu3 %v274_v51  ;;  %845 = vmatmul.f32.gmra.mxu1 %v1515_v18  ;;  %v441_v39 = vld [vmem:[#allocation2 + $0x820] sm:$0xff]  ;;  %v562_v50 = vld [vmem:[#allocation2 + $0xbe8] sm:$0xff]  ;;  %v427_v51 = vld [vmem:[#allocation2 + $0x7b0] sm:$0xff] }
  0x96   : > { %976 = vmatpush.msrb.mxu2 %v521_v52  ;;  %918 = vmatpush.msrb.mxu0 %v265_v53  ;;  %v185_v40 = vld [vmem:[#allocation2 + $0x20] sm:$0xff]  ;;  %v291_v52 = vld [vmem:[#allocation2 + $0x370] sm:$0xff]  ;;  %v418_v53 = vld [vmem:[#allocation2 + $0x768] sm:$0xff] }
  0x97   : > { %946 = vmatpush.msrb.mxu1 %v401_v54  ;;  %1005 = vmatpush.msrb.mxu3 %v266_v55  ;;  %v321_v41 = vld [vmem:[#allocation2 + $0x460] sm:$0xff]  ;;  %v554_v54 = vld [vmem:[#allocation2 + $0xba8] sm:$0xff]  ;;  %v283_v55 = vld [vmem:[#allocation2 + $0x330] sm:$0xff] }
  0x98   : > { %977 = vmatpush.msrb.mxu2 %v513_v58  ;;  %919 = vmatpush.msrb.mxu0 %v257_v59  ;;  %v313_v45 = vld [vmem:[#allocation2 + $0x420] sm:$0xff]  ;;  %v410_v58 = vld [vmem:[#allocation2 + $0x728] sm:$0xff] }
  0x99   : > { %947 = vmatpush.msrb.mxu1 %v393_v60  ;;  %1006 = vmatpush.msrb.mxu3 %v258_v61  ;;  %v546_v59 = vld [vmem:[#allocation2 + $0xb68] sm:$0xff]  ;;  %v411_v60 = vld [vmem:[#allocation2 + $0x730] sm:$0xff] }
  0x9a   : > { %978 = vmatpush.msrb.mxu2 %v505_v1  ;;  %920 = vmatpush.msrb.mxu0 %v249_v2  ;;  %v402_v61 = vld [vmem:[#allocation2 + $0x6e8] sm:$0xff] }
  0x9b   : > { %948 = vmatpush.msrb.mxu1 %v385_v3  ;;  %1007 = vmatpush.msrb.mxu3 %v250_v4  ;;  %v538_v2 = vld [vmem:[#allocation2 + $0xb28] sm:$0xff]  ;;  %v403_v3 = vld [vmem:[#allocation2 + $0x6f0] sm:$0xff] }
  0x9c   : > { %819 = vmatmul.f32.gmra.mxu0 %v1531_v38  ;;  %877 = vmatmul.f32.gmra.mxu2 %v1537_v43 }
  0x9d   : > { %906 = vmatmul.f32.gmra.mxu3 %v1531_v38  ;;  %979 = vmatpush.msrb.mxu2 %v497_v6  ;;  %v267_v6 = vld [vmem:[#allocation2 + $0x2b0] sm:$0xff] }
  0x9e   : > { %921 = vmatpush.msrb.mxu0 %v241_v7  ;;  %949 = vmatpush.msrb.mxu1 %v377_v8  ;;  %v394_v7 = vld [vmem:[#allocation2 + $0x6a8] sm:$0xff] }
  0x9f   : > { %1008 = vmatpush.msrb.mxu3 %v242_v9  ;;  %848 = vmatmul.f32.gmra.mxu1 %v1528_v37  ;;  %v530_v8 = vld [vmem:[#allocation2 + $0xae8] sm:$0xff] }
  0xa0   : > { %980 = vmatpush.msrb.mxu2 %v489_v10  ;;  %922 = vmatpush.msrb.mxu0 %v233_v11  ;;  %v395_v10 = vld [vmem:[#allocation2 + $0x6b0] sm:$0xff] }
  0xa1   : > { %950 = vmatpush.msrb.mxu1 %v369_v12  ;;  %1009 = vmatpush.msrb.mxu3 %v234_v13  ;;  %v259_v11 = vld [vmem:[#allocation2 + $0x270] sm:$0xff] }
  0xa2   : > { %981 = vmatpush.msrb.mxu2 %v481_v14  ;;  %923 = vmatpush.msrb.mxu0 %v225_v15  ;;  %v387_v14 = vld [vmem:[#allocation2 + $0x670] sm:$0xff] }
  0xa3   : > { %951 = vmatpush.msrb.mxu1 %v361_v16  ;;  %1010 = vmatpush.msrb.mxu3 %v226_v17  ;;  %v251_v15 = vld [vmem:[#allocation2 + $0x230] sm:$0xff]  ;;  %v378_v17 = vld [vmem:[#allocation2 + $0x628] sm:$0xff] }
  0xa4   : > { %982 = vmatpush.msrb.mxu2 %v473_v20  ;;  %924 = vmatpush.msrb.mxu0 %v217_v21  ;;  %v514_v20 = vld [vmem:[#allocation2 + $0xa68] sm:$0xff]  ;;  %v379_v21 = vld [vmem:[#allocation2 + $0x630] sm:$0xff] }
  0xa5   : > { %952 = vmatpush.msrb.mxu1 %v353_v22  ;;  %1011 = vmatpush.msrb.mxu3 %v218_v23  ;;  %v370_v22 = vld [vmem:[#allocation2 + $0x5e8] sm:$0xff] }
  0xa6   : > { %822 = vmatmul.f32.gmra.mxu0 %v1544_v57  ;;  %880 = vmatmul.f32.gmra.mxu2 %v1550_v62 }
  0xa7   : > { %909 = vmatmul.f32.gmra.mxu3 %v1544_v57  ;;  %983 = vmatpush.msrb.mxu2 %v465_v25  ;;  %v506_v25 = vld [vmem:[#allocation2 + $0xa28] sm:$0xff] }
  0xa8   : > { %925 = vmatpush.msrb.mxu0 %v209_v26  ;;  %953 = vmatpush.msrb.mxu1 %v345_v27  ;;  %v371_v26 = vld [vmem:[#allocation2 + $0x5f0] sm:$0xff] }
  0xa9   : > { %1012 = vmatpush.msrb.mxu3 %v210_v28  ;;  %851 = vmatmul.f32.gmra.mxu1 %v1541_v56  ;;  %v235_v28 = vld [vmem:[#allocation2 + $0x1b0] sm:$0xff] }
  0xaa   : > { %984 = vmatpush.msrb.mxu2 %v457_v29  ;;  %926 = vmatpush.msrb.mxu0 %v201_v30  ;;  %v362_v29 = vld [vmem:[#allocation2 + $0x5a8] sm:$0xff] }
  0xab   : > { %954 = vmatpush.msrb.mxu1 %v337_v31  ;;  %1013 = vmatpush.msrb.mxu3 %v202_v32  ;;  %v498_v30 = vld [vmem:[#allocation2 + $0x9e8] sm:$0xff]  ;;  %v363_v32 = vld [vmem:[#allocation2 + $0x5b0] sm:$0xff] }
  0xac   : > { %985 = vmatpush.msrb.mxu2 %v449_v33  ;;  %927 = vmatpush.msrb.mxu0 %v193_v34  ;;  %v227_v33 = vld [vmem:[#allocation2 + $0x170] sm:$0xff] }
  0xad   : > { %955 = vmatpush.msrb.mxu1 %v329_v35  ;;  %1014 = vmatpush.msrb.mxu3 %v194_v36  ;;  %v354_v35 = vld [vmem:[#allocation2 + $0x568] sm:$0xff] }
  0xae   : > { %986 = vmatpush.msrb.mxu2 %v441_v39  ;;  %928 = vmatpush.msrb.mxu0 %v185_v40  ;;  %v490_v36 = vld [vmem:[#allocation2 + $0x9a8] sm:$0xff]  ;;  %v219_v39 = vld [vmem:[#allocation2 + $0x130] sm:$0xff] }
  0xaf   : > { %956 = vmatpush.msrb.mxu1 %v321_v41  ;;  %1015 = vmatpush.msrb.mxu3 %v186_v42  ;;  %v346_v41 = vld [vmem:[#allocation2 + $0x528] sm:$0xff] }
  0xb0   : > { %929 = vmatmul.f32.vlgmr.msrb.gmra.mxu0 %v1502_v63  ;;  %987 = vmatmul.f32.vlgmr.msrb.gmra.mxu2 %v1505_v0  ;;  %v419_v0 = vld [vmem:[#allocation2 + $0x770] sm:$0xff]  ;;  %v482_v42 = vld [vmem:[#allocation2 + $0x968] sm:$0xff] }
  0xb1   : > { %1016 = vmatmul.f32.vlgmr.msrb.gmra.mxu3 %v1502_v63  ;;  %1087 = vmatpush.msra.mxu2 %v307_v44  ;;  %v347_v44 = vld [vmem:[#allocation2 + $0x530] sm:$0xff] }
  0xb2   : > { %957 = vmatpush.msrb.mxu1 %v313_v45  ;;  %1029 = vmatpush.msra.mxu0 %v434_v46  ;;  %v338_v45 = vld [vmem:[#allocation2 + $0x4e8] sm:$0xff] }
  0xb3   : > { %1116 = vmatpush.msra.mxu3 %v435_v47  ;;  %958 = vmatmul.f32.vlgmr.msrb.gmra.mxu1 %v1511_v5  ;;  %v275_v5 = vld [vmem:[#allocation2 + $0x2f0] sm:$0xff]  ;;  %v474_v47 = vld [vmem:[#allocation2 + $0x928] sm:$0xff] }
  0xb4   : > { %1088 = vmatpush.msra.mxu2 %v299_v48  ;;  %1030 = vmatpush.msra.mxu0 %v426_v49  ;;  %v339_v48 = vld [vmem:[#allocation2 + $0x4f0] sm:$0xff] }
  0xb5   : > { %1058 = vmatpush.msra.mxu1 %v562_v50  ;;  %1117 = vmatpush.msra.mxu3 %v427_v51  ;;  %v203_v50 = vld [vmem:[#allocation2 + $0xb0] sm:$0xff]  ;;  %v330_v51 = vld [vmem:[#allocation2 + $0x4a8] sm:$0xff] }
  0xb6   : > { %1089 = vmatpush.msra.mxu2 %v291_v52  ;;  %1031 = vmatpush.msra.mxu0 %v418_v53  ;;  %v466_v52 = vld [vmem:[#allocation2 + $0x8e8] sm:$0xff] }
  0xb7   : > { %1059 = vmatpush.msra.mxu1 %v554_v54  ;;  %1118 = vmatpush.msra.mxu3 %v419_v0  ;;  %v331_v54 = vld [vmem:[#allocation2 + $0x4b0] sm:$0xff] }
  0xb8   : > { %1090 = vmatpush.msra.mxu2 %v283_v55  ;;  %1032 = vmatpush.msra.mxu0 %v410_v58  ;;  %v195_v0 = vld [vmem:[#allocation2 + $0x70] sm:$0xff]  ;;  %v458_v58 = vld [vmem:[#allocation2 + $0x8a8] sm:$0xff] }
  0xb9   : > { %v582_v63 = vpop.f32.mrf.mxu0  ;;  %1060 = vmatpush.msra.mxu1 %v546_v59  ;;  %1119 = vmatpush.msra.mxu3 %v411_v60  ;;  %v187_v59 = vld [vmem:[#allocation2 + $0x30] sm:$0xff] }
  0xba   : > { %932 = vmatmul.f32.gmra.mxu0 %v1515_v18  ;;  %990 = vmatmul.f32.gmra.mxu2 %v1518_v19  ;;  %v522_v19 = vld [vmem:[#allocation2 + $0xaa8] sm:$0xff] }
  0xbb   : > { %1019 = vmatmul.f32.gmra.mxu3 %v1515_v18  ;;  %1091 = vmatpush.msra.mxu2 %v275_v5  ;;  %v386_v18 = vld [vmem:[#allocation2 + $0x668] sm:$0xff] }
  0xbc   : > { %v611_v1 = vpop.f32.mrf.mxu1  ;;  %1033 = vmatpush.msra.mxu0 %v402_v61  ;;  %1061 = vmatpush.msra.mxu1 %v538_v2  ;;  %v314_v5 = vld [vmem:[#allocation2 + $0x428] sm:$0xff] }
  0xbd   : > { %v612_v4 = vadd.f32 %v611_v1, %v582_v63  ;;  %1120 = vmatpush.msra.mxu3 %v403_v3  ;;  %961 = vmatmul.f32.gmra.mxu1 %v1524_v24  ;;  %v243_v24 = vld [vmem:[#allocation2 + $0x1f0] sm:$0xff]  ;;  %v322_v63 = vld [vmem:[#allocation2 + $0x468] sm:$0xff]  ;;  %v436_v1 = vld [vmem:[#allocation2 + $0x7f8] sm:$0xff] }
  0xbe   : > { %1092 = vmatpush.msra.mxu2 %v267_v6  ;;  %1034 = vmatpush.msra.mxu0 %v394_v7  ;;  %v450_v61 = vld [vmem:[#allocation2 + $0x868] sm:$0xff]  ;;  %v563_v6 = vld [vmem:[#allocation2 + $0xbf0] sm:$0xff] }
  0xbf   : > { %v640_v9 = vpop.f32.mrf.mxu2  ;;  %1062 = vmatpush.msra.mxu1 %v530_v8  ;;  %1121 = vmatpush.msra.mxu3 %v395_v10  ;;  %v442_v2 = vld [vmem:[#allocation2 + $0x828] sm:$0xff]  ;;  %v1621_v8 = vld [vmem:[%s1499_s22] sm:$0xff]  ;;  %v564_v10 = vld [vmem:[#allocation2 + $0xbf8] sm:$0xff] }
  0xc0   : > { %v641_v12 = vadd.f32 %v640_v9, %v612_v4  ;;  %v1599_v13 = vpop.f32.mrf.mxu3  ;;  %1093 = vmatpush.msra.mxu2 %v259_v11  ;;  %1035 = vmatpush.msra.mxu0 %v386_v18  ;;  %v1617_v4 = vld [vmem:[%s1499_s22 + $0x8] sm:$0xff]  ;;  %v428_v9 = vld [vmem:[#allocation2 + $0x7b8] sm:$0xff]  ;;  %v555_v11 = vld [vmem:[#allocation2 + $0xbb0] sm:$0xff] }
  0xc1   : > { %1063 = vmatpush.msra.mxu1 %v522_v19  ;;  %1122 = vmatpush.msra.mxu3 %v387_v14  ;;  %v1626_v19 = vld [vmem:[%s1499_s22 + $0x10] sm:$0xff]  ;;  %v420_v14 = vld [vmem:[#allocation2 + $0x778] sm:$0xff] }
  0xc2   : > { %1261 = vst [vmem:[%s1596_s26] sm:$0xff] %v641_v12  ;;  %v585_v16 = vpop.f32.mrf.mxu0  ;;  %1094 = vmatpush.msra.mxu2 %v251_v15  ;;  %1036 = vmatpush.msra.mxu0 %v378_v17  ;;  %v308_v12 = vld [vmem:[#allocation2 + $0x3f8] sm:$0xff]  ;;  %v547_v17 = vld [vmem:[#allocation2 + $0xb70] sm:$0xff] }
  0xc3   : > { %1064 = vmatpush.msra.mxu1 %v514_v20  ;;  %1123 = vmatpush.msra.mxu3 %v379_v21  ;;  %v556_v15 = vld [vmem:[#allocation2 + $0xbb8] sm:$0xff] }
  0xc4   : > { %935 = vmatmul.f32.gmra.mxu0 %v1528_v37  ;;  %993 = vmatmul.f32.gmra.mxu2 %v1531_v38  ;;  %v300_v20 = vld [vmem:[#allocation2 + $0x3b8] sm:$0xff] }
  0xc5   : > { %v614_v23 = vpop.f32.mrf.mxu1  ;;  %1022 = vmatmul.f32.gmra.mxu3 %v1528_v37  ;;  %1095 = vmatpush.msra.mxu2 %v243_v24  ;;  %v355_v37 = vld [vmem:[#allocation2 + $0x570] sm:$0xff]  ;;  %v412_v24 = vld [vmem:[#allocation2 + $0x738] sm:$0xff] }
  0xc6   : > { %v615_v27 = vadd.f32 %v614_v23, %v585_v16  ;;  %1037 = vmatpush.msra.mxu0 %v370_v22  ;;  %1065 = vmatpush.msra.mxu1 %v506_v25  ;;  %v548_v22 = vld [vmem:[#allocation2 + $0xb78] sm:$0xff]  ;;  %v539_v25 = vld [vmem:[#allocation2 + $0xb30] sm:$0xff] }
  0xc7   : > { %1124 = vmatpush.msra.mxu3 %v371_v26  ;;  %964 = vmatmul.f32.gmra.mxu1 %v1537_v43  ;;  %v211_v43 = vld [vmem:[#allocation2 + $0xf0] sm:$0xff] }
  0xc8   : > { %v643_v31 = vpop.f32.mrf.mxu2  ;;  %1096 = vmatpush.msra.mxu2 %v235_v28  ;;  %1038 = vmatpush.msra.mxu0 %v362_v29  ;;  %v540_v28 = vld [vmem:[#allocation2 + $0xb38] sm:$0xff] }
  0xc9   : > { %v644_v34 = vadd.f32 %v643_v31, %v615_v27  ;;  %v1606_v38 = vpop.f32.mrf.mxu3  ;;  %1066 = vmatpush.msra.mxu1 %v498_v30  ;;  %1125 = vmatpush.msra.mxu3 %v363_v32  ;;  %v404_v27 = vld [vmem:[#allocation2 + $0x6f8] sm:$0xff]  ;;  %v531_v30 = vld [vmem:[#allocation2 + $0xaf0] sm:$0xff]  ;;  %v1638_v32 = vld [vmem:[%s1499_s22 + $0x20] sm:$0xff] }
  0xca   : > { %1097 = vmatpush.msra.mxu2 %v227_v33  ;;  %1039 = vmatpush.msra.mxu0 %v354_v35  ;;  %v1634_v29 = vld [vmem:[%s1499_s22 + $0x18] sm:$0xff] }
  0xcb   : > { %1269 = vst [vmem:[%s1596_s26 + $0x40] sm:$0xff] %v644_v34  ;;  %v588_v40 = vpop.f32.mrf.mxu0  ;;  %1067 = vmatpush.msra.mxu1 %v490_v36  ;;  %1126 = vmatpush.msra.mxu3 %v355_v37  ;;  %v396_v33 = vld [vmem:[#allocation2 + $0x6b8] sm:$0xff]  ;;  %v523_v36 = vld [vmem:[#allocation2 + $0xab0] sm:$0xff]  ;;  %v1643_v37 = vld [vmem:[%s1499_s22 + $0x28] sm:$0xff] }
  0xcc   : > { %1098 = vmatpush.msra.mxu2 %v219_v39  ;;  %1040 = vmatpush.msra.mxu0 %v346_v41  ;;  %v532_v35 = vld [vmem:[#allocation2 + $0xaf8] sm:$0xff] }
  0xcd   : > { %1068 = vmatpush.msra.mxu1 %v482_v42  ;;  %1127 = vmatpush.msra.mxu3 %v347_v44  ;;  %v284_v39 = vld [vmem:[#allocation2 + $0x338] sm:$0xff]  ;;  %v515_v44 = vld [vmem:[#allocation2 + $0xa70] sm:$0xff] }
  0xce   : > { %v617_v46 = vpop.f32.mrf.mxu1  ;;  %938 = vmatmul.f32.gmra.mxu0 %v1541_v56  ;;  %996 = vmatmul.f32.gmra.mxu2 %v1544_v57  ;;  %v524_v42 = vld [vmem:[#allocation2 + $0xab8] sm:$0xff] }
  0xcf   : > { %v618_v49 = vadd.f32 %v617_v46, %v588_v40  ;;  %1025 = vmatmul.f32.gmra.mxu3 %v1541_v56  ;;  %1099 = vmatpush.msra.mxu2 %v211_v43  ;;  %v323_v56 = vld [vmem:[#allocation2 + $0x470] sm:$0xff]  ;;  %v388_v40 = vld [vmem:[#allocation2 + $0x678] sm:$0xff] }
  0xd0   : > { %1041 = vmatpush.msra.mxu0 %v338_v45  ;;  %1069 = vmatpush.msra.mxu1 %v474_v47  ;;  %v276_v43 = vld [vmem:[#allocation2 + $0x2f8] sm:$0xff] }
  0xd1   : > { %v646_v53 = vpop.f32.mrf.mxu2  ;;  %1128 = vmatpush.msra.mxu3 %v339_v48  ;;  %967 = vmatmul.f32.gmra.mxu1 %v1550_v62  ;;  %v315_v62 = vld [vmem:[#allocation2 + $0x430] sm:$0xff]  ;;  %v380_v45 = vld [vmem:[#allocation2 + $0x638] sm:$0xff] }
  0xd2   : > { %v647_v55 = vadd.f32 %v646_v53, %v618_v49  ;;  %1100 = vmatpush.msra.mxu2 %v203_v50  ;;  %v1613_v57 = vpop.f32.mrf.mxu3  ;;  %1042 = vmatpush.msra.mxu0 %v330_v51  ;;  %v516_v47 = vld [vmem:[#allocation2 + $0xa78] sm:$0xff]  ;;  %v507_v48 = vld [vmem:[#allocation2 + $0xa30] sm:$0xff] }
  0xd3   : > { %1070 = vmatpush.msra.mxu1 %v466_v52  ;;  %1129 = vmatpush.msra.mxu3 %v331_v54  ;;  %v268_v51 = vld [vmem:[#allocation2 + $0x2b8] sm:$0xff] }
  0xd4   : > { %1277 = vst [vmem:[%s1596_s26 + $0x80] sm:$0xff] %v647_v55  ;;  %v591_v60 = vpop.f32.mrf.mxu0  ;;  %1101 = vmatpush.msra.mxu2 %v195_v0  ;;  %1043 = vmatpush.msra.mxu0 %v322_v63  ;;  %v372_v52 = vld [vmem:[#allocation2 + $0x5f8] sm:$0xff]  ;;  %v1657_v0 = vld [vmem:[%s1499_s22 + $0x30] sm:$0xff] }
  0xd5   : > { %1071 = vmatpush.msra.mxu1 %v458_v58  ;;  %1130 = vmatpush.msra.mxu3 %v323_v56  ;;  %v508_v53 = vld [vmem:[#allocation2 + $0xa38] sm:$0xff]  ;;  %v499_v55 = vld [vmem:[#allocation2 + $0x9f0] sm:$0xff] }
  0xd6   : > { %1102 = vmatpush.msra.mxu2 %v187_v59  ;;  %1044 = vmatpush.msra.mxu0 %v314_v5  ;;  %v1653_v54 = vld [vmem:[%s1499_s22 + $0x38] sm:$0xff]  ;;  %v1662_v5 = vld [vmem:[%s1499_s22 + $0x40] sm:$0xff] }
  0xd7   : > { %1072 = vmatpush.msra.mxu1 %v450_v61  ;;  %v620_v3 = vpop.f32.mrf.mxu1  ;;  %1131 = vmatpush.msra.mxu3 %v315_v62  ;;  %v364_v58 = vld [vmem:[#allocation2 + $0x5b8] sm:$0xff] }
  0xd8   : > { %1045 = vmatmul.f32.vlgmr.msra.gmra.mxu0 %v1617_v4  ;;  %v621_v7 = vadd.f32 %v620_v3, %v591_v60  ;;  %1103 = vmatmul.f32.vlgmr.msra.gmra.mxu2 %v1621_v8  ;;  %v500_v59 = vld [vmem:[#allocation2 + $0x9f8] sm:$0xff]  ;;  %v491_v60 = vld [vmem:[#allocation2 + $0x9b0] sm:$0xff] }
  0xd9   : > { %1132 = vmatmul.f32.vlgmr.msra.gmra.mxu3 %v1617_v4  ;;  %1203 = vmatpush.msrb.mxu2 %v436_v1  ;;  %v252_v61 = vld [vmem:[#allocation2 + $0x238] sm:$0xff]  ;;  %v483_v3 = vld [vmem:[#allocation2 + $0x970] sm:$0xff] }
  0xda   : > { %1073 = vmatpush.msra.mxu1 %v442_v2  ;;  %v649_v18 = vpop.f32.mrf.mxu2  ;;  %1145 = vmatpush.msrb.mxu0 %v563_v6  ;;  %v356_v62 = vld [vmem:[#allocation2 + $0x578] sm:$0xff] }
  0xdb   : > { %1074 = vmatmul.f32.vlgmr.msra.gmra.mxu1 %v1626_v19  ;;  %v650_v16 = vadd.f32 %v649_v18, %v621_v7  ;;  %1204 = vmatpush.msrb.mxu2 %v428_v9  ;;  %v1629_v21 = vpop.f32.mrf.mxu3  ;;  %v492_v2 = vld [vmem:[#allocation2 + $0x9b8] sm:$0xff] }
  0xdc   : > { %1232 = vmatpush.msrb.mxu3 %v564_v10  ;;  %1146 = vmatpush.msrb.mxu0 %v555_v11  ;;  %v244_v6 = vld [vmem:[#allocation2 + $0x1f8] sm:$0xff]  ;;  %v475_v11 = vld [vmem:[#allocation2 + $0x930] sm:$0xff] }
  0xdd   : > { %1174 = vmatpush.msrb.mxu1 %v308_v12  ;;  %1285 = vst [vmem:[%s1596_s26 + $0xc0] sm:$0xff] %v650_v16  ;;  %v698_v23 = vpop.f32.mrf.mxu0  ;;  %1205 = vmatpush.msrb.mxu2 %v420_v14  ;;  %v348_v7 = vld [vmem:[#allocation2 + $0x538] sm:$0xff] }
  0xde   : > { %1233 = vmatpush.msrb.mxu3 %v556_v15  ;;  %v699_v26 = vadd.f32 %v698_v23, %v1599_v13  ;;  %1147 = vmatpush.msrb.mxu0 %v547_v17  ;;  %v292_v13 = vld [vmem:[#allocation2 + $0x378] sm:$0xff]  ;;  %v1672_v17 = vld [vmem:[%s1499_s22 + $0x50] sm:$0xff] }
  0xdf   : > { %1175 = vmatpush.msrb.mxu1 %v300_v20  ;;  %1206 = vmatpush.msrb.mxu2 %v412_v24  ;;  %v484_v10 = vld [vmem:[#allocation2 + $0x978] sm:$0xff]  ;;  %v1676_v20 = vld [vmem:[%s1499_s22 + $0x48] sm:$0xff]  ;;  %v467_v24 = vld [vmem:[#allocation2 + $0x8f0] sm:$0xff] }
  0xe0   : > { %1234 = vmatpush.msrb.mxu3 %v548_v22  ;;  %1148 = vmatpush.msrb.mxu0 %v539_v25  ;;  %v727_v31 = vpop.f32.mrf.mxu1  ;;  %v236_v14 = vld [vmem:[#allocation2 + $0x1b8] sm:$0xff] }
  0xe1   : > { %1106 = vmatmul.f32.gmra.mxu2 %v1634_v29  ;;  %1048 = vmatmul.f32.gmra.mxu0 %v1638_v32  ;;  %v728_v34 = vadd.f32 %v727_v31, %v699_v26  ;;  %v340_v15 = vld [vmem:[#allocation2 + $0x4f8] sm:$0xff] }
  0xe2   : > { %1135 = vmatmul.f32.gmra.mxu3 %v1638_v32  ;;  %1207 = vmatpush.msrb.mxu2 %v404_v27  ;;  %v476_v16 = vld [vmem:[#allocation2 + $0x938] sm:$0xff]  ;;  %v459_v27 = vld [vmem:[#allocation2 + $0x8b0] sm:$0xff] }
  0xe3   : > { %1235 = vmatpush.msrb.mxu3 %v540_v28  ;;  %1149 = vmatpush.msrb.mxu0 %v531_v30  ;;  %1262 = vst [vmem:[%s1596_s26 + $0x8] sm:$0xff] %v728_v34  ;;  %v1647_v41 = vpop.f32.mrf.mxu2  ;;  %v332_v23 = vld [vmem:[#allocation2 + $0x4b8] sm:$0xff]  ;;  %v451_v34 = vld [vmem:[#allocation2 + $0x870] sm:$0xff] }
  0xe4   : > { %1077 = vmatmul.f32.gmra.mxu1 %v1643_v37  ;;  %1208 = vmatpush.msrb.mxu2 %v396_v33  ;;  %v1649_v46 = vpop.f32.mrf.mxu3  ;;  %v468_v26 = vld [vmem:[#allocation2 + $0x8f8] sm:$0xff] }
  0xe5   : > { %1176 = vmatpush.msrb.mxu1 %v292_v13  ;;  %1236 = vmatpush.msrb.mxu3 %v532_v35  ;;  %v1681_v28 = vld [vmem:[%s1499_s22 + $0x58] sm:$0xff] }
  0xe6   : > { %1150 = vmatpush.msrb.mxu0 %v523_v36  ;;  %1209 = vmatpush.msrb.mxu2 %v388_v40  ;;  %v220_v30 = vld [vmem:[#allocation2 + $0x138] sm:$0xff] }
  0xe7   : > { %1177 = vmatpush.msrb.mxu1 %v284_v39  ;;  %v701_v49 = vpop.f32.mrf.mxu0  ;;  %1237 = vmatpush.msrb.mxu3 %v524_v42  ;;  %v324_v31 = vld [vmem:[#allocation2 + $0x478] sm:$0xff]  ;;  %v443_v42 = vld [vmem:[#allocation2 + $0x830] sm:$0xff] }
  0xe8   : > { %1151 = vmatpush.msrb.mxu0 %v515_v44  ;;  %v702_v50 = vadd.f32 %v701_v49, %v1606_v38  ;;  %1210 = vmatpush.msrb.mxu2 %v380_v45  ;;  %v260_v38 = vld [vmem:[#allocation2 + $0x278] sm:$0xff] }
  0xe9   : > { %1178 = vmatpush.msrb.mxu1 %v276_v43  ;;  %1238 = vmatpush.msrb.mxu3 %v516_v47  ;;  %v460_v33 = vld [vmem:[#allocation2 + $0x8b8] sm:$0xff] }
  0xea   : > { %1152 = vmatpush.msrb.mxu0 %v507_v48  ;;  %1109 = vmatmul.f32.gmra.mxu2 %v1657_v0  ;;  %v730_v63 = vpop.f32.mrf.mxu1  ;;  %v212_v35 = vld [vmem:[#allocation2 + $0xf8] sm:$0xff] }
  0xeb   : > { %1051 = vmatmul.f32.gmra.mxu0 %v1653_v54  ;;  %1138 = vmatmul.f32.gmra.mxu3 %v1653_v54  ;;  %v731_v56 = vadd.f32 %v730_v63, %v702_v50  ;;  %v316_v36 = vld [vmem:[#allocation2 + $0x438] sm:$0xff] }
  0xec   : > { %1179 = vmatpush.msrb.mxu1 %v268_v51  ;;  %1211 = vmatpush.msrb.mxu2 %v372_v52  ;;  %v452_v40 = vld [vmem:[#allocation2 + $0x878] sm:$0xff]  ;;  %v786_v52 = vadd.f32 %v1649_v46, %v1647_v41 }
  0xed   : > { %1239 = vmatpush.msrb.mxu3 %v508_v53  ;;  %1153 = vmatpush.msrb.mxu0 %v499_v55  ;;  %1270 = vst [vmem:[%s1596_s26 + $0x48] sm:$0xff] %v731_v56  ;;  %v1666_v1 = vpop.f32.mrf.mxu2  ;;  %v204_v43 = vld [vmem:[#allocation2 + $0xb8] sm:$0xff] }
  0xee   : > { %1080 = vmatmul.f32.gmra.mxu1 %v1662_v5  ;;  %1212 = vmatpush.msrb.mxu2 %v364_v58  ;;  %v1668_v9 = vpop.f32.mrf.mxu3  ;;  %v444_v47 = vld [vmem:[#allocation2 + $0x838] sm:$0xff] }
  0xef   : > { %1180 = vmatpush.msrb.mxu1 %v260_v38  ;;  %1240 = vmatpush.msrb.mxu3 %v500_v59  ;;  %v196_v48 = vld [vmem:[#allocation2 + $0x78] sm:$0xff] }
  0xf0   : > { %1154 = vmatpush.msrb.mxu0 %v491_v60  ;;  %1213 = vmatpush.msrb.mxu2 %v356_v62  ;;  %v188_v50 = vld [vmem:[#allocation2 + $0x38] sm:$0xff] }
  0xf1   : > { %1181 = vmatpush.msrb.mxu1 %v252_v61  ;;  %v704_v12 = vpop.f32.mrf.mxu0  ;;  %1241 = vmatpush.msrb.mxu3 %v492_v2 }
  0xf2   : > { %1155 = vmatpush.msrb.mxu0 %v483_v3  ;;  %v705_v18 = vadd.f32 %v704_v12, %v1613_v57  ;;  %1214 = vmatpush.msrb.mxu2 %v348_v7  ;;  %v228_v57 = vld [vmem:[#allocation2 + $0x178] sm:$0xff] }
  0xf3   : > { %1182 = vmatpush.msrb.mxu1 %v244_v6  ;;  %1242 = vmatpush.msrb.mxu3 %v484_v10 }
  0xf4   : > { %1156 = vmatpush.msrb.mxu0 %v475_v11  ;;  %1112 = vmatmul.f32.gmra.mxu2 %v1676_v20  ;;  %v733_v22 = vpop.f32.mrf.mxu1 }
  0xf5   : > { %1054 = vmatmul.f32.gmra.mxu0 %v1672_v17  ;;  %1141 = vmatmul.f32.gmra.mxu3 %v1672_v17  ;;  %v734_v25 = vadd.f32 %v733_v22, %v705_v18 }
  0xf6   : > { %1183 = vmatpush.msrb.mxu1 %v236_v14  ;;  %1215 = vmatpush.msrb.mxu2 %v340_v15 }
  0xf7   : > { %1243 = vmatpush.msrb.mxu3 %v476_v16  ;;  %1157 = vmatpush.msrb.mxu0 %v467_v24  ;;  %1278 = vst [vmem:[%s1596_s26 + $0x88] sm:$0xff] %v734_v25  ;;  %v1685_v13 = vpop.f32.mrf.mxu2 }
  0xf8   : > { %1083 = vmatmul.f32.gmra.mxu1 %v1681_v28  ;;  %1216 = vmatpush.msrb.mxu2 %v332_v23  ;;  %v791_v39 = vpop.f32.mrf.mxu3 }
  0xf9   : > { %1184 = vmatpush.msrb.mxu1 %v228_v57  ;;  %1244 = vmatpush.msrb.mxu3 %v468_v26  ;;  %v792_v59 = vadd.f32 %v791_v39, %v1685_v13 }
  0xfa   : > { %1158 = vmatpush.msrb.mxu0 %v459_v27  ;;  %1217 = vmatpush.msrb.mxu2 %v324_v31 }
  0xfb   : > { %1185 = vmatpush.msrb.mxu1 %v220_v30  ;;  %v707_v44 = vpop.f32.mrf.mxu0  ;;  %1245 = vmatpush.msrb.mxu3 %v460_v33 }
  0xfc   : > { %1159 = vmatpush.msrb.mxu0 %v451_v34  ;;  %v708_v45 = vadd.f32 %v707_v44, %v1629_v21  ;;  %1218 = vmatpush.msrb.mxu2 %v316_v36 }
  0xfd   : > { %1186 = vmatpush.msrb.mxu1 %v212_v35  ;;  %1246 = vmatpush.msrb.mxu3 %v452_v40 }
  0xfe   : > { %1160 = vmatpush.msrb.mxu0 %v443_v42  ;;  %v736_v49 = vpop.f32.mrf.mxu1  ;;  %1219 = vmatmul.f32.vlgmr.msrb.gmra.mxu2 %v1617_v4 }
  0xff   : > { %1161 = vmatmul.f32.vlgmr.msrb.gmra.mxu0 %v1626_v19  ;;  %1187 = vmatpush.msrb.mxu1 %v204_v43  ;;  %v737_v51 = vadd.f32 %v736_v49, %v708_v45 }
 0x100   : > { %1247 = vmatpush.msrb.mxu3 %v444_v47 }
 0x101   : > { %1188 = vmatpush.msrb.mxu1 %v196_v48  ;;  %1248 = vmatmul.f32.vlgmr.msrb.gmra.mxu3 %v1626_v19  ;;  %1286 = vst [vmem:[%s1596_s26 + $0xc8] sm:$0xff] %v737_v51  ;;  %v765_v21 = vpop.f32.mrf.mxu2 }
 0x102   : > { %v794_v53 = vpop.f32.mrf.mxu3 }
 0x103   : > { %1189 = vmatpush.msrb.mxu1 %v188_v50  ;;  %v795_v2 = vadd.f32 %v794_v53, %v765_v21 }
 0x104   : > { %1190 = vmatmul.f32.vlgmr.msrb.gmra.mxu1 %v1621_v8  ;;  %v789_v8 = vadd.f32 %v1668_v9, %v1666_v1 }
 0x105   : > { %v814_v55 = vpop.f32.mrf.mxu0 }
 0x106   : > { %v815_v63 = vadd.f32 %v814_v55, %v786_v52  ;;  %1222 = vmatmul.f32.gmra.mxu2 %v1638_v32 }
 0x107   : > { %1164 = vmatmul.f32.gmra.mxu0 %v1643_v37 }
 0x108   : > { %1263 = vst [vmem:[%s1596_s26 + $0x10] sm:$0xff] %v815_v63  ;;  %v843_v4 = vpop.f32.mrf.mxu1 }
 0x109   : > { %1251 = vmatmul.f32.gmra.mxu3 %v1643_v37 }
 0x10b   : > { %v872_v19 = vpop.f32.mrf.mxu2 }
 0x10c   : > { %1193 = vmatmul.f32.gmra.mxu1 %v1634_v29  ;;  %v873_v38 = vadd.f32 %v872_v19, %v843_v4  ;;  %v901_v41 = vpop.f32.mrf.mxu3 }
 0x10e   : > { %v902_v46 = vadd.f32 %v901_v41, %v873_v38  ;;  %1225 = vmatmul.f32.gmra.mxu2 %v1653_v54 }
 0x10f   : > { %1167 = vmatmul.f32.gmra.mxu0 %v1662_v5  ;;  %v817_v58 = vpop.f32.mrf.mxu0 }
 0x110   : > { %v818_v32 = vadd.f32 %v817_v58, %v789_v8  ;;  %1264 = vst [vmem:[%s1596_s26 + $0x18] sm:$0xff] %v902_v46 }
 0x111   : > { %1254 = vmatmul.f32.gmra.mxu3 %v1662_v5 }
 0x112   : > { %1271 = vst [vmem:[%s1596_s26 + $0x50] sm:$0xff] %v818_v32  ;;  %v846_v29 = vpop.f32.mrf.mxu1 }
 0x114   : > { %1196 = vmatmul.f32.gmra.mxu1 %v1657_v0 }
 0x115   : > { %v875_v37 = vpop.f32.mrf.mxu2 }
 0x116   : > { %v876_v56 = vadd.f32 %v875_v37, %v846_v29  ;;  %1228 = vmatmul.f32.gmra.mxu2 %v1672_v17  ;;  %v904_v60 = vpop.f32.mrf.mxu3 }
 0x117   : > { %1170 = vmatmul.f32.gmra.mxu0 %v1681_v28 }
 0x118   : > { %v905_v54 = vadd.f32 %v904_v60, %v876_v56 }
 0x119   : > { %1257 = vmatmul.f32.gmra.mxu3 %v1681_v28  ;;  %v820_v5 = vpop.f32.mrf.mxu0 }
 0x11a   : > { %v821_v61 = vadd.f32 %v820_v5, %v792_v59  ;;  %1272 = vst [vmem:[%s1596_s26 + $0x58] sm:$0xff] %v905_v54 }
 0x11c   : > { %1199 = vmatmul.f32.gmra.mxu1 %v1676_v20  ;;  %1279 = vst [vmem:[%s1596_s26 + $0x90] sm:$0xff] %v821_v61  ;;  %v849_v0 = vpop.f32.mrf.mxu1 }
 0x11f   : > { %v878_v62 = vpop.f32.mrf.mxu2 }
 0x120   : > { %v879_v1 = vadd.f32 %v878_v62, %v849_v0  ;;  %v907_v3 = vpop.f32.mrf.mxu3 }
 0x122   : > { %v908_v6 = vadd.f32 %v907_v3, %v879_v1 }
 0x123   : > { %v823_v7 = vpop.f32.mrf.mxu0 }
 0x124   : > { %v824_v9 = vadd.f32 %v823_v7, %v795_v2  ;;  %1280 = vst [vmem:[%s1596_s26 + $0x98] sm:$0xff] %v908_v6 }
 0x126   : > { %1287 = vst [vmem:[%s1596_s26 + $0xd0] sm:$0xff] %v824_v9  ;;  %v852_v10 = vpop.f32.mrf.mxu1 }
 0x129   : > { %v881_v11 = vpop.f32.mrf.mxu2 }
 0x12a   : > { %v882_v12 = vadd.f32 %v881_v11, %v852_v10  ;;  %v910_v18 = vpop.f32.mrf.mxu3 }
 0x12c   : > { %v911_v14 = vadd.f32 %v910_v18, %v882_v12 }
 0x12d   : > { %v930_v15 = vpop.f32.mrf.mxu0 }
 0x12e   : > { %1288 = vst [vmem:[%s1596_s26 + $0xd8] sm:$0xff] %v911_v14 }
 0x130   : > { %v959_v16 = vpop.f32.mrf.mxu1 }
 0x131   : > { %v960_v17 = vadd.f32 %v959_v16, %v930_v15 }
 0x133   : > { %v988_v20 = vpop.f32.mrf.mxu2 }
 0x134   : > { %v989_v24 = vadd.f32 %v988_v20, %v960_v17  ;;  %v1017_v22 = vpop.f32.mrf.mxu3 }
 0x136   : > { %1265 = vst [vmem:[%s1596_s26 + $0x20] sm:$0xff] %v989_v24 }
 0x137   : > { %v933_v57 = vpop.f32.mrf.mxu0 }
 0x13a   : > { %v962_v23 = vpop.f32.mrf.mxu1 }
 0x13b   : > { %v963_v25 = vadd.f32 %v962_v23, %v933_v57 }
 0x13d   : > { %v991_v26 = vpop.f32.mrf.mxu2 }
 0x13e   : > { %v992_v27 = vadd.f32 %v991_v26, %v963_v25  ;;  %v1020_v28 = vpop.f32.mrf.mxu3 }
 0x140   : > { %1273 = vst [vmem:[%s1596_s26 + $0x60] sm:$0xff] %v992_v27 }
 0x141   : > { %v936_v30 = vpop.f32.mrf.mxu0 }
 0x144   : > { %v965_v31 = vpop.f32.mrf.mxu1 }
 0x145   : > { %v966_v13 = vadd.f32 %v965_v31, %v936_v30 }
 0x147   : > { %v994_v33 = vpop.f32.mrf.mxu2 }
 0x148   : > { %v995_v34 = vadd.f32 %v994_v33, %v966_v13  ;;  %v1023_v35 = vpop.f32.mrf.mxu3 }
 0x14a   : > { %1281 = vst [vmem:[%s1596_s26 + $0xa0] sm:$0xff] %v995_v34 }
 0x14b   : > { %v939_v36 = vpop.f32.mrf.mxu0 }
 0x14e   : > { %v968_v39 = vpop.f32.mrf.mxu1 }
 0x14f   : > { %v969_v40 = vadd.f32 %v968_v39, %v939_v36 }
 0x151   : > { %v997_v42 = vpop.f32.mrf.mxu2 }
 0x152   : > { %v998_v44 = vadd.f32 %v997_v42, %v969_v40  ;;  %v1026_v43 = vpop.f32.mrf.mxu3 }
 0x154   : > { %1289 = vst [vmem:[%s1596_s26 + $0xe0] sm:$0xff] %v998_v44 }
 0x155   : > { %v1046_v45 = vpop.f32.mrf.mxu0 }
 0x156   : > { %v1047_v47 = vadd.f32 %v1046_v45, %v1017_v22 }
 0x158   : > { %v1075_v48 = vpop.f32.mrf.mxu1 }
 0x159   : > { %v1076_v49 = vadd.f32 %v1075_v48, %v1047_v47 }
 0x15b   : > { %1266 = vst [vmem:[%s1596_s26 + $0x28] sm:$0xff] %v1076_v49  ;;  %v1104_v50 = vpop.f32.mrf.mxu2 }
 0x15c   : > { %v1133_v51 = vpop.f32.mrf.mxu3 }
 0x15d   : > { %v1134_v60 = vadd.f32 %v1133_v51, %v1104_v50 }
 0x15e   : > { %v1049_v21 = vpop.f32.mrf.mxu0 }
 0x15f   : > { %v1050_v52 = vadd.f32 %v1049_v21, %v1020_v28 }
 0x161   : > { %v1078_v53 = vpop.f32.mrf.mxu1 }
 0x162   : > { %v1079_v55 = vadd.f32 %v1078_v53, %v1050_v52 }
 0x164   : > { %1274 = vst [vmem:[%s1596_s26 + $0x68] sm:$0xff] %v1079_v55  ;;  %v1107_v63 = vpop.f32.mrf.mxu2 }
 0x165   : > { %v1136_v4 = vpop.f32.mrf.mxu3 }
 0x166   : > { %v1137_v62 = vadd.f32 %v1136_v4, %v1107_v63 }
 0x168   : > { %v1052_v19 = vpop.f32.mrf.mxu0 }
 0x169   : > { %v1053_v38 = vadd.f32 %v1052_v19, %v1023_v35 }
 0x16b   : > { %v1081_v8 = vpop.f32.mrf.mxu1 }
 0x16c   : > { %v1082_v41 = vadd.f32 %v1081_v8, %v1053_v38 }
 0x16d   : > { %v1110_v46 = vpop.f32.mrf.mxu2 }
 0x16e   : > { %1282 = vst [vmem:[%s1596_s26 + $0xa8] sm:$0xff] %v1082_v41  ;;  %v1139_v58 = vpop.f32.mrf.mxu3 }
 0x16f   : > { %v1140_v11 = vadd.f32 %v1139_v58, %v1110_v46 }
 0x172   : > { %v1055_v32 = vpop.f32.mrf.mxu0 }
 0x173   : > { %v1056_v29 = vadd.f32 %v1055_v32, %v1026_v43 }
 0x175   : > { %v1084_v37 = vpop.f32.mrf.mxu1 }
 0x176   : > { %v1085_v56 = vadd.f32 %v1084_v37, %v1056_v29 }
 0x177   : > { %v1113_v59 = vpop.f32.mrf.mxu2 }
 0x178   : > { %1290 = vst [vmem:[%s1596_s26 + $0xe8] sm:$0xff] %v1085_v56  ;;  %v1142_v54 = vpop.f32.mrf.mxu3 }
 0x179   : > { %v1143_v24 = vadd.f32 %v1142_v54, %v1113_v59 }
 0x17c   : > { %v1162_v5 = vpop.f32.mrf.mxu0 }
 0x17d   : > { %v1163_v61 = vadd.f32 %v1162_v5, %v1134_v60 }
 0x17f   : > { %1267 = vst [vmem:[%s1596_s26 + $0x30] sm:$0xff] %v1163_v61 }
 0x181   : > { %v1191_v0 = vpop.f32.mrf.mxu1  ;;  %v1220_v1 = vpop.f32.mrf.mxu2 }
 0x182   : > { %v1221_v2 = vadd.f32 %v1220_v1, %v1191_v0 }
 0x184   : > { %v1165_v3 = vpop.f32.mrf.mxu0  ;;  %v1249_v6 = vpop.f32.mrf.mxu3 }
 0x185   : > { %v1166_v7 = vadd.f32 %v1165_v3, %v1137_v62  ;;  %v1250_v9 = vadd.f32 %v1249_v6, %v1221_v2 }
 0x187   : > { %1275 = vst [vmem:[%s1596_s26 + $0x70] sm:$0xff] %v1166_v7 }
 0x188   : > { %1268 = vst [vmem:[%s1596_s26 + $0x38] sm:$0xff] %v1250_v9 }
 0x189   : > { %v1194_v10 = vpop.f32.mrf.mxu1  ;;  %v1223_v12 = vpop.f32.mrf.mxu2 }
 0x18a   : > { %v1224_v18 = vadd.f32 %v1223_v12, %v1194_v10 }
 0x18c   : > { %v1168_v14 = vpop.f32.mrf.mxu0  ;;  %v1252_v15 = vpop.f32.mrf.mxu3 }
 0x18d   : > { %v1169_v16 = vadd.f32 %v1168_v14, %v1140_v11  ;;  %v1253_v17 = vadd.f32 %v1252_v15, %v1224_v18 }
 0x18f   : > { %1283 = vst [vmem:[%s1596_s26 + $0xb0] sm:$0xff] %v1169_v16 }
 0x190   : > { %1276 = vst [vmem:[%s1596_s26 + $0x78] sm:$0xff] %v1253_v17 }
 0x191   : > { %v1197_v20 = vpop.f32.mrf.mxu1  ;;  %v1226_v22 = vpop.f32.mrf.mxu2 }
 0x192   : > { %v1227_v57 = vadd.f32 %v1226_v22, %v1197_v20 }
 0x194   : > { %v1171_v23 = vpop.f32.mrf.mxu0  ;;  %v1255_v25 = vpop.f32.mrf.mxu3 }
 0x195   : > { %v1172_v26 = vadd.f32 %v1171_v23, %v1143_v24  ;;  %v1256_v27 = vadd.f32 %v1255_v25, %v1227_v57 }
 0x197   : > { %1291 = vst [vmem:[%s1596_s26 + $0xf0] sm:$0xff] %v1172_v26 }
 0x198   : > { %1284 = vst [vmem:[%s1596_s26 + $0xb8] sm:$0xff] %v1256_v27 }
 0x199   : > { %v1200_v28 = vpop.f32.mrf.mxu1  ;;  %v1229_v30 = vpop.f32.mrf.mxu2 }
 0x19a   : > { %v1230_v31 = vadd.f32 %v1229_v30, %v1200_v28 }
 0x19c   : > { %v1258_v13 = vpop.f32.mrf.mxu3 }
 0x19d   : > { %v1259_v33 = vadd.f32 %v1258_v13, %v1230_v31 }
 0x19f   : > { %1292 = vst [vmem:[%s1596_s26 + $0xf8] sm:$0xff] %v1259_v33 }
 0x1a0 PF: > { %s13_s9 = sadd.s32 1, %s1452_s9  }
 0x1a1   : > { %p10_p7 = scmp.ge.s32.totalorder %s13_s9, 4  }
 0x1a3   :  { %12 = sbr.rel (!%p10_p7) target bundleno = 1 (0x1), region = 63 }
 0x1a8   :  { %1317 = vsyncpa [#allocation3], 1 }
 0x1a9   :  { %1319 = vsyncpa [#allocation3 + $0x1], 1 }

</bundles_post_ra>
